<compile_context>
chip_gen: v6e
topology: v6e:2x2x1
jax: 0.10.0
libtpu: 0.0.40
codegen_flags: <defaults>
</compile_context>

<pallas_src>
from functools import partial

import jax
import jax.numpy as jnp
from jax.experimental import pallas as pl
from jax.experimental.pallas import tpu as pltpu

C_IN = 3
C_OUT = 3
K = 3


def _cdiv(a, b):
    return -(-a // b)


# ---------------------------------------------------------------------------
# One-time probe: use the XLU rotate (pltpu.roll) for the kh/kw shifts, but
# verify its lowering + jnp.roll-compatible semantics once; fall back to
# jnp.roll (concat-of-slices) if anything is off on this jax/libtpu combo.
# ---------------------------------------------------------------------------
_ROLL_SIGN_CACHE = None


def _probe_roll_sign():
    def k(x_ref, o_ref):
        o_ref[...] = pltpu.roll(pltpu.roll(x_ref[...], 1, 1), 1, 0)

    x = jnp.arange(8 * 128, dtype=jnp.float32).reshape(8, 128)
    try:
        y = pl.pallas_call(
            k, out_shape=jax.ShapeDtypeStruct((8, 128), jnp.float32))(x)
        y = jax.block_until_ready(y)
    except Exception:                     # rotate lowering unavailable
        return 0
    if bool(jnp.array_equal(y, jnp.roll(jnp.roll(x, 1, 1), 1, 0))):
        return 1                          # jnp.roll convention
    if bool(jnp.array_equal(y, jnp.roll(jnp.roll(x, -1, 1), -1, 0))):
        return -1                         # opposite convention
    return 0


def _roll_sign():
    global _ROLL_SIGN_CACHE
    if _ROLL_SIGN_CACHE is None:
        _ROLL_SIGN_CACHE = _probe_roll_sign()
    return _ROLL_SIGN_CACHE


def _shift(p, delta, axis, roll_sign):
    """jnp.roll(p, delta, axis) (out[i] = p[(i - delta) % n]) via an XLU rotate
    when the plane is vreg-aligned and the rotate was validated, else jnp.roll."""
    n = p.shape[axis]
    delta %= n
    if delta == 0:
        return p
    if roll_sign != 0 and p.shape[-1] % 128 == 0 and p.shape[-2] % 8 == 0:
        amount = delta if roll_sign > 0 else (n - delta)
        return pltpu.roll(p, amount, axis)
    return jnp.roll(p, delta, axis)


# ---------------------------------------------------------------------------
# Kernel
# ---------------------------------------------------------------------------
def _conv3x3_kernel(x_ref, w_ref, b_ref, o_ref, *, img_w, roll_sign):
    """Valid 3x3 conv (stride 1, bias) on one block.

    x_ref : (n_groups, C_IN, H, Wx) VMEM, Wx = per_group * img_w (per_group
            images laid side by side along the lane axis).
    w_ref : (C_OUT*C_IN*K*K,) f32 SMEM, row-major [co, ci, kh, kw].
    b_ref : (C_OUT,) f32 SMEM.
    o_ref : (n_groups * per_group, C_OUT, Ho, Wo) VMEM.
    """
    n_groups, _, H, Wx = x_ref.shape
    Ho, Wo = o_ref.shape[2], o_ref.shape[3]
    per_group = Wx // img_w

    for bx in range(n_groups):
        # 3 full-height plane loads (one per input channel; no sublane-offset
        # kh slices).  kh realized as a sublane rotate: rows[ci][kh][h, :] ==
        # plane[h + kh, :] for every stored row h < Ho (wrap rows only land at
        # h >= Ho, which are never stored).
        rows = []
        for ci in range(C_IN):
            base = x_ref[bx, ci].astype(jnp.float32)
            rows.append([_shift(base, -kh, 0, roll_sign) for kh in range(K)])

        # One output channel at a time -> a single live (H, Wx) f32 accumulator.
        for co in range(C_OUT):
            acc = jnp.full((H, Wx), b_ref[co], dtype=jnp.float32)  # hoisted bias
            for ci in range(C_IN):
                for kh in range(K):
                    p = rows[ci][kh]
                    for kw in range(K):
                        # Lane rotate: s[:, w] == p[:, w + kw] for every stored
                        # column; wrap / cross-image lanes only land at
                        # w_local >= Wo inside each image stripe (never stored).
                        s = _shift(p, -kw, 1, roll_sign)
                        widx = ((co * C_IN + ci) * K + kh) * K + kw
                        # scalar (SMEM) * plane + acc: 2 VALU ops per MAC.
                        acc = acc + w_ref[widx] * s
            # Fused batch un-fold + valid-window slice at the store: the output
            # array is already (N, C_OUT, Ho, Wo) -> no wrapper epilogue pass.
            for j in range(per_group):
                o_ref[bx * per_group + j, co] = (
                    acc[:Ho, j * img_w:j * img_w + Wo].astype(o_ref.dtype))


# ---------------------------------------------------------------------------
# Block planning + wrapper
# ---------------------------------------------------------------------------
def _plan_blocks(N, H, W, target_bytes):
    """Return (fold, images_per_block, padded_N)."""
    fold = W < 128                      # fold batch into lanes only if lane-sparse
    # ~bytes one image contributes to a block: f32 input + output + ~a dozen
    # plane-sized kernel temporaries (rolled planes + accumulator).
    per_img = 4 * H * W * (C_IN + C_OUT + 12)
    nb_cap = max(1, target_bytes // per_img)

    if fold:
        nb_min = min(N, _cdiv(128, W))  # fill the 128-lane vreg if N allows
        nb = max(nb_min, min(nb_cap, N))
        # Keep >=2 grid chunks (v7x megacore) only if it costs no lane density.
        if N >= 2 * nb_min:
            nb = min(nb, max(nb_min, _cdiv(N, 2)))
    else:
        nb_min = 1
        nb = max(1, min(nb_cap, N))
        if N >= 2:
            nb = min(nb, _cdiv(N, 2))

    # Rebalance so the (possibly padded) batch splits as evenly as possible.
    num_blocks = _cdiv(N, nb)
    nb = max(nb_min, _cdiv(N, num_blocks))
    n_padded = _cdiv(N, nb) * nb
    return fold, nb, n_padded


def conv2d_3x3(x, weight, bias, *, target_bytes=4 << 20):
    """x: (N, 3, H, W); weight: (3, 3, 3, 3); bias: (3,) -> (N, 3, H-2, W-2)."""
    N, C, H, W = x.shape
    assert C == C_IN and H >= K and W >= K
    Ho, Wo = H - (K - 1), W - (K - 1)

    fold, nb, Np = _plan_blocks(N, H, W, target_bytes)
    G = Np // nb
    roll_sign = _roll_sign()

    xp = x
    if Np != N:  # pad the batch to a whole number of blocks (never shrink nb)
        xp = jnp.concatenate(
            [x, jnp.zeros((Np - N,) + x.shape[1:], x.dtype)], axis=0)

    if fold:
        # Fold nb images into the lane axis: (G, C, H, nb*W).  This is the only
        # wrapper HBM pass; the output un-fold/slice is fused into the kernel.
        NBW = nb * W
        x_in = (xp.reshape(G, nb, C_IN, H, W)
                  .transpose(0, 2, 3, 1, 4)
                  .reshape(G, C_IN, H, NBW))
        in_spec = pl.BlockSpec((1, C_IN, H, NBW), lambda g: (g, 0, 0, 0))
    else:
        # Lane axis already dense (W >= 128): no wrapper reshape/transpose.
        x_in = xp
        in_spec = pl.BlockSpec((nb, C_IN, H, W), lambda g: (g, 0, 0, 0))

    w_flat = weight.reshape(-1).astype(jnp.float32)
    b = bias.astype(jnp.float32)

    out = pl.pallas_call(
        partial(_conv3x3_kernel, img_w=W, roll_sign=roll_sign),
        out_shape=jax.ShapeDtypeStruct((Np, C_OUT, Ho, Wo), x.dtype),
        grid_spec=pltpu.PrefetchScalarGridSpec(
            num_scalar_prefetch=0,
            grid=(G,),
            in_specs=[
                in_spec,
                pl.BlockSpec(memory_space=pltpu.MemorySpace.SMEM),
                pl.BlockSpec(memory_space=pltpu.MemorySpace.SMEM),
            ],
            out_specs=pl.BlockSpec((nb, C_OUT, Ho, Wo), lambda g: (g, 0, 0, 0)),
        ),
        compiler_params=pltpu.CompilerParams(
            dimension_semantics=("parallel",),
            vmem_limit_bytes=32 << 20,
        ),
    )(x_in, w_flat, b)

    return out[:N] if Np != N else out


def _reference_conv(x, weight, bias):
    y = jax.lax.conv_general_dilated(
        x, weight, window_strides=(1, 1), padding="VALID",
        dimension_numbers=("NCHW", "OIHW", "NCHW"))
    return y + bias[None, :, None, None]


if __name__ == "__main__":
    key = jax.random.PRNGKey(0)
    kx1, kx2, kw_key, kb_key = jax.random.split(key, 4)

    # Deterministic Conv2d(3, 3, kernel_size=3) parameters (PyTorch-like init).
    fan_in = C_IN * K * K
    bound = 1.0 / float(fan_in) ** 0.5
    weight = jax.random.uniform(kw_key, (C_OUT, C_IN, K, K), jnp.float32, -bound, bound)
    bias = jax.random.uniform(kb_key, (C_OUT,), jnp.float32, -bound, bound)

    # Case 1: small spatial (W < 128) -> batch folded into the lane axis.
    x1 = jax.random.normal(kx1, (2, 3, 16, 16), dtype=jnp.float32)
    y1 = jax.block_until_ready(conv2d_3x3(x1, weight, bias))
    assert y1.shape == (2, 3, 14, 14), y1.shape
    assert jnp.allclose(y1, _reference_conv(x1, weight, bias), atol=1e-5, rtol=1e-5)

    # Case 2: lane-dense spatial (W >= 128) -> no fold, no wrapper transposes.
    x2 = jax.random.normal(kx2, (2, 3, 8, 128), dtype=jnp.float32)
    y2 = jax.block_until_ready(conv2d_3x3(x2, weight, bias))
    assert y2.shape == (2, 3, 6, 126), y2.shape
    assert jnp.allclose(y2, _reference_conv(x2, weight, bias), atol=1e-5, rtol=1e-5)

    print("KERNEL_OK")
</pallas_src>

<mosaic_0001>
module attributes {stable_mosaic.version = 11 : i64} {
  func.func @k(%arg0: memref<8x128xf32, #tpu.memory_space<vmem>>, %arg1: memref<8x128xf32, #tpu.memory_space<vmem>>) attributes {dimension_semantics = [], scalar_prefetch = 0 : i64, scratch_operands = 0 : i64, tpu.core_type = #tpu.core_type<tc>} {
    %c0 = arith.constant 0 : index
    %c0_0 = arith.constant 0 : index
    %0 = vector.load %arg0[%c0, %c0_0] : memref<8x128xf32, #tpu.memory_space<vmem>>, vector<8x128xf32>
    %c1_i32 = arith.constant 1 : i32
    %1 = tpu.dynamic_rotate %0 by %c1_i32 dim 1 : vector<8x128xf32>, i32 -> vector<8x128xf32>
    %c1_i32_1 = arith.constant 1 : i32
    %2 = tpu.dynamic_rotate %1 by %c1_i32_1 dim 0 : vector<8x128xf32>, i32 -> vector<8x128xf32>
    %c0_2 = arith.constant 0 : index
    %c0_3 = arith.constant 0 : index
    %3 = vector.load %arg1[%c0_2, %c0_3] : memref<8x128xf32, #tpu.memory_space<vmem>>, vector<8x128xf32>
    tpu.vector_store %arg1[%c0_2, %c0_3], %2 {strides = array<i32>} : memref<8x128xf32, #tpu.memory_space<vmem>>, vector<8x128xf32>,
    return
  }
}

module attributes {stable_mosaic.version = 11 : i64} {
  func.func @_conv3x3_kernel(%arg0: i32, %arg1: memref<1x3x16x32xf32, #tpu.memory_space<vmem>>, %arg2: memref<81xf32, #tpu.memory_space<smem>>, %arg3: memref<3xf32, #tpu.memory_space<smem>>, %arg4: memref<2x3x14x14xf32, #tpu.memory_space<vmem>>) attributes {dimension_semantics = [#tpu.dimension_semantics<parallel>], iteration_bounds = array<i64: 1>, scalar_prefetch = 0 : i64, scratch_operands = 0 : i64, tpu.core_type = #tpu.core_type<tc>, window_params = [{transform_indices = @transform_0, window_bounds = array<i64: 1, 3, 16, 32>}, {transform_indices = @transform_1, window_bounds = array<i64: 81>}, {transform_indices = @transform_2, window_bounds = array<i64: 3>}, {transform_indices = @transform_3, window_bounds = array<i64: 2, 3, 14, 14>}]} {
    %c0 = arith.constant 0 : index
    %c0_0 = arith.constant 0 : index
    %c0_1 = arith.constant 0 : index
    %c0_2 = arith.constant 0 : index
    %0 = vector.load %arg1[%c0, %c0_0, %c0_1, %c0_2] : memref<1x3x16x32xf32, #tpu.memory_space<vmem>>, vector<1x1x16x32xf32>
    %1 = vector.shape_cast %0 : vector<1x1x16x32xf32> to vector<16x32xf32>
    %2 = vector.extract_strided_slice %1 {offsets = [1, 0], sizes = [15, 32], strides = [1, 1]} : vector<16x32xf32> to vector<15x32xf32>
    %3 = vector.extract_strided_slice %1 {offsets = [0, 0], sizes = [1, 32], strides = [1, 1]} : vector<16x32xf32> to vector<1x32xf32>
    %4 = tpu.concatenate %2, %3 in 0 : vector<15x32xf32>, vector<1x32xf32> -> vector<16x32xf32>
    %5 = vector.extract_strided_slice %1 {offsets = [2, 0], sizes = [14, 32], strides = [1, 1]} : vector<16x32xf32> to vector<14x32xf32>
    %6 = vector.extract_strided_slice %1 {offsets = [0, 0], sizes = [2, 32], strides = [1, 1]} : vector<16x32xf32> to vector<2x32xf32>
    %7 = tpu.concatenate %5, %6 in 0 : vector<14x32xf32>, vector<2x32xf32> -> vector<16x32xf32>
    %c0_3 = arith.constant 0 : index
    %c1 = arith.constant 1 : index
    %c0_4 = arith.constant 0 : index
    %c0_5 = arith.constant 0 : index
    %8 = vector.load %arg1[%c0_3, %c1, %c0_4, %c0_5] : memref<1x3x16x32xf32, #tpu.memory_space<vmem>>, vector<1x1x16x32xf32>
    %9 = vector.shape_cast %8 : vector<1x1x16x32xf32> to vector<16x32xf32>
    %10 = vector.extract_strided_slice %9 {offsets = [1, 0], sizes = [15, 32], strides = [1, 1]} : vector<16x32xf32> to vector<15x32xf32>
    %11 = vector.extract_strided_slice %9 {offsets = [0, 0], sizes = [1, 32], strides = [1, 1]} : vector<16x32xf32> to vector<1x32xf32>
    %12 = tpu.concatenate %10, %11 in 0 : vector<15x32xf32>, vector<1x32xf32> -> vector<16x32xf32>
    %13 = vector.extract_strided_slice %9 {offsets = [2, 0], sizes = [14, 32], strides = [1, 1]} : vector<16x32xf32> to vector<14x32xf32>
    %14 = vector.extract_strided_slice %9 {offsets = [0, 0], sizes = [2, 32], strides = [1, 1]} : vector<16x32xf32> to vector<2x32xf32>
    %15 = tpu.concatenate %13, %14 in 0 : vector<14x32xf32>, vector<2x32xf32> -> vector<16x32xf32>
    %c0_6 = arith.constant 0 : index
    %c2 = arith.constant 2 : index
    %c0_7 = arith.constant 0 : index
    %c0_8 = arith.constant 0 : index
    %16 = vector.load %arg1[%c0_6, %c2, %c0_7, %c0_8] : memref<1x3x16x32xf32, #tpu.memory_space<vmem>>, vector<1x1x16x32xf32>
    %17 = vector.shape_cast %16 : vector<1x1x16x32xf32> to vector<16x32xf32>
    %18 = vector.extract_strided_slice %17 {offsets = [1, 0], sizes = [15, 32], strides = [1, 1]} : vector<16x32xf32> to vector<15x32xf32>
    %19 = vector.extract_strided_slice %17 {offsets = [0, 0], sizes = [1, 32], strides = [1, 1]} : vector<16x32xf32> to vector<1x32xf32>
    %20 = tpu.concatenate %18, %19 in 0 : vector<15x32xf32>, vector<1x32xf32> -> vector<16x32xf32>
    %21 = vector.extract_strided_slice %17 {offsets = [2, 0], sizes = [14, 32], strides = [1, 1]} : vector<16x32xf32> to vector<14x32xf32>
    %22 = vector.extract_strided_slice %17 {offsets = [0, 0], sizes = [2, 32], strides = [1, 1]} : vector<16x32xf32> to vector<2x32xf32>
    %23 = tpu.concatenate %21, %22 in 0 : vector<14x32xf32>, vector<2x32xf32> -> vector<16x32xf32>
    %c0_9 = arith.constant 0 : index
    %24 = memref.load %arg3[%c0_9] : memref<3xf32, #tpu.memory_space<smem>>
    %25 = vector.broadcast %24 : f32 to vector<16x32xf32>
    %c0_10 = arith.constant 0 : index
    %26 = memref.load %arg2[%c0_10] : memref<81xf32, #tpu.memory_space<smem>>
    %27 = vector.broadcast %26 : f32 to vector<16x32xf32>
    %28 = arith.mulf %27, %1 : vector<16x32xf32>
    %29 = arith.addf %25, %28 : vector<16x32xf32>
    %30 = vector.extract_strided_slice %1 {offsets = [0, 1], sizes = [16, 31], strides = [1, 1]} : vector<16x32xf32> to vector<16x31xf32>
    %31 = vector.extract_strided_slice %1 {offsets = [0, 0], sizes = [16, 1], strides = [1, 1]} : vector<16x32xf32> to vector<16x1xf32>
    %32 = tpu.concatenate %30, %31 in 1 : vector<16x31xf32>, vector<16x1xf32> -> vector<16x32xf32>
    %c1_11 = arith.constant 1 : index
    %33 = memref.load %arg2[%c1_11] : memref<81xf32, #tpu.memory_space<smem>>
    %34 = vector.broadcast %33 : f32 to vector<16x32xf32>
    %35 = arith.mulf %34, %32 : vector<16x32xf32>
    %36 = arith.addf %29, %35 : vector<16x32xf32>
    %37 = vector.extract_strided_slice %1 {offsets = [0, 2], sizes = [16, 30], strides = [1, 1]} : vector<16x32xf32> to vector<16x30xf32>
    %38 = vector.extract_strided_slice %1 {offsets = [0, 0], sizes = [16, 2], strides = [1, 1]} : vector<16x32xf32> to vector<16x2xf32>
    %39 = tpu.concatenate %37, %38 in 1 : vector<16x30xf32>, vector<16x2xf32> -> vector<16x32xf32>
    %c2_12 = arith.constant 2 : index
    %40 = memref.load %arg2[%c2_12] : memref<81xf32, #tpu.memory_space<smem>>
    %41 = vector.broadcast %40 : f32 to vector<16x32xf32>
    %42 = arith.mulf %41, %39 : vector<16x32xf32>
    %43 = arith.addf %36, %42 : vector<16x32xf32>
    %c3 = arith.constant 3 : index
    %44 = memref.load %arg2[%c3] : memref<81xf32, #tpu.memory_space<smem>>
    %45 = vector.broadcast %44 : f32 to vector<16x32xf32>
    %46 = arith.mulf %45, %4 : vector<16x32xf32>
    %47 = arith.addf %43, %46 : vector<16x32xf32>
    %48 = vector.extract_strided_slice %4 {offsets = [0, 1], sizes = [16, 31], strides = [1, 1]} : vector<16x32xf32> to vector<16x31xf32>
    %49 = vector.extract_strided_slice %4 {offsets = [0, 0], sizes = [16, 1], strides = [1, 1]} : vector<16x32xf32> to vector<16x1xf32>
    %50 = tpu.concatenate %48, %49 in 1 : vector<16x31xf32>, vector<16x1xf32> -> vector<16x32xf32>
    %c4 = arith.constant 4 : index
    %51 = memref.load %arg2[%c4] : memref<81xf32, #tpu.memory_space<smem>>
    %52 = vector.broadcast %51 : f32 to vector<16x32xf32>
    %53 = arith.mulf %52, %50 : vector<16x32xf32>
    %54 = arith.addf %47, %53 : vector<16x32xf32>
    %55 = vector.extract_strided_slice %4 {offsets = [0, 2], sizes = [16, 30], strides = [1, 1]} : vector<16x32xf32> to vector<16x30xf32>
    %56 = vector.extract_strided_slice %4 {offsets = [0, 0], sizes = [16, 2], strides = [1, 1]} : vector<16x32xf32> to vector<16x2xf32>
    %57 = tpu.concatenate %55, %56 in 1 : vector<16x30xf32>, vector<16x2xf32> -> vector<16x32xf32>
    %c5 = arith.constant 5 : index
    %58 = memref.load %arg2[%c5] : memref<81xf32, #tpu.memory_space<smem>>
    %59 = vector.broadcast %58 : f32 to vector<16x32xf32>
    %60 = arith.mulf %59, %57 : vector<16x32xf32>
    %61 = arith.addf %54, %60 : vector<16x32xf32>
    %c6 = arith.constant 6 : index
    %62 = memref.load %arg2[%c6] : memref<81xf32, #tpu.memory_space<smem>>
    %63 = vector.broadcast %62 : f32 to vector<16x32xf32>
    %64 = arith.mulf %63, %7 : vector<16x32xf32>
    %65 = arith.addf %61, %64 : vector<16x32xf32>
    %66 = vector.extract_strided_slice %7 {offsets = [0, 1], sizes = [16, 31], strides = [1, 1]} : vector<16x32xf32> to vector<16x31xf32>
    %67 = vector.extract_strided_slice %7 {offsets = [0, 0], sizes = [16, 1], strides = [1, 1]} : vector<16x32xf32> to vector<16x1xf32>
    %68 = tpu.concatenate %66, %67 in 1 : vector<16x31xf32>, vector<16x1xf32> -> vector<16x32xf32>
    %c7 = arith.constant 7 : index
    %69 = memref.load %arg2[%c7] : memref<81xf32, #tpu.memory_space<smem>>
    %70 = vector.broadcast %69 : f32 to vector<16x32xf32>
    %71 = arith.mulf %70, %68 : vector<16x32xf32>
    %72 = arith.addf %65, %71 : vector<16x32xf32>
    %73 = vector.extract_strided_slice %7 {offsets = [0, 2], sizes = [16, 30], strides = [1, 1]} : vector<16x32xf32> to vector<16x30xf32>
    %74 = vector.extract_strided_slice %7 {offsets = [0, 0], sizes = [16, 2], strides = [1, 1]} : vector<16x32xf32> to vector<16x2xf32>
    %75 = tpu.concatenate %73, %74 in 1 : vector<16x30xf32>, vector<16x2xf32> -> vector<16x32xf32>
    %c8 = arith.constant 8 : index
    %76 = memref.load %arg2[%c8] : memref<81xf32, #tpu.memory_space<smem>>
    %77 = vector.broadcast %76 : f32 to vector<16x32xf32>
    %78 = arith.mulf %77, %75 : vector<16x32xf32>
    %79 = arith.addf %72, %78 : vector<16x32xf32>
    %c9 = arith.constant 9 : index
    %80 = memref.load %arg2[%c9] : memref<81xf32, #tpu.memory_space<smem>>
    %81 = vector.broadcast %80 : f32 to vector<16x32xf32>
    %82 = arith.mulf %81, %9 : vector<16x32xf32>
    %83 = arith.addf %79, %82 : vector<16x32xf32>
    %84 = vector.extract_strided_slice %9 {offsets = [0, 1], sizes = [16, 31], strides = [1, 1]} : vector<16x32xf32> to vector<16x31xf32>
    %85 = vector.extract_strided_slice %9 {offsets = [0, 0], sizes = [16, 1], strides = [1, 1]} : vector<16x32xf32> to vector<16x1xf32>
    %86 = tpu.concatenate %84, %85 in 1 : vector<16x31xf32>, vector<16x1xf32> -> vector<16x32xf32>
    %c10 = arith.constant 10 : index
    %87 = memref.load %arg2[%c10] : memref<81xf32, #tpu.memory_space<smem>>
    %88 = vector.broadcast %87 : f32 to vector<16x32xf32>
    %89 = arith.mulf %88, %86 : vector<16x32xf32>
    %90 = arith.addf %83, %89 : vector<16x32xf32>
    %91 = vector.extract_strided_slice %9 {offsets = [0, 2], sizes = [16, 30], strides = [1, 1]} : vector<16x32xf32> to vector<16x30xf32>
    %92 = vector.extract_strided_slice %9 {offsets = [0, 0], sizes = [16, 2], strides = [1, 1]} : vector<16x32xf32> to vector<16x2xf32>
    %93 = tpu.concatenate %91, %92 in 1 : vector<16x30xf32>, vector<16x2xf32> -> vector<16x32xf32>
    %c11 = arith.constant 11 : index
    %94 = memref.load %arg2[%c11] : memref<81xf32, #tpu.memory_space<smem>>
    %95 = vector.broadcast %94 : f32 to vector<16x32xf32>
    %96 = arith.mulf %95, %93 : vector<16x32xf32>
    %97 = arith.addf %90, %96 : vector<16x32xf32>
    %c12 = arith.constant 12 : index
    %98 = memref.load %arg2[%c12] : memref<81xf32, #tpu.memory_space<smem>>
    %99 = vector.broadcast %98 : f32 to vector<16x32xf32>
    %100 = arith.mulf %99, %12 : vector<16x32xf32>
    %101 = arith.addf %97, %100 : vector<16x32xf32>
    %102 = vector.extract_strided_slice %12 {offsets = [0, 1], sizes = [16, 31], strides = [1, 1]} : vector<16x32xf32> to vector<16x31xf32>
    %103 = vector.extract_strided_slice %12 {offsets = [0, 0], sizes = [16, 1], strides = [1, 1]} : vector<16x32xf32> to vector<16x1xf32>
    %104 = tpu.concatenate %102, %103 in 1 : vector<16x31xf32>, vector<16x1xf32> -> vector<16x32xf32>
    %c13 = arith.constant 13 : index
    %105 = memref.load %arg2[%c13] : memref<81xf32, #tpu.memory_space<smem>>
    %106 = vector.broadcast %105 : f32 to vector<16x32xf32>
    %107 = arith.mulf %106, %104 : vector<16x32xf32>
    %108 = arith.addf %101, %107 : vector<16x32xf32>
    %109 = vector.extract_strided_slice %12 {offsets = [0, 2], sizes = [16, 30], strides = [1, 1]} : vector<16x32xf32> to vector<16x30xf32>
    %110 = vector.extract_strided_slice %12 {offsets = [0, 0], sizes = [16, 2], strides = [1, 1]} : vector<16x32xf32> to vector<16x2xf32>
    %111 = tpu.concatenate %109, %110 in 1 : vector<16x30xf32>, vector<16x2xf32> -> vector<16x32xf32>
    %c14 = arith.constant 14 : index
    %112 = memref.load %arg2[%c14] : memref<81xf32, #tpu.memory_space<smem>>
    %113 = vector.broadcast %112 : f32 to vector<16x32xf32>
    %114 = arith.mulf %113, %111 : vector<16x32xf32>
    %115 = arith.addf %108, %114 : vector<16x32xf32>
    %c15 = arith.constant 15 : index
    %116 = memref.load %arg2[%c15] : memref<81xf32, #tpu.memory_space<smem>>
    %117 = vector.broadcast %116 : f32 to vector<16x32xf32>
    %118 = arith.mulf %117, %15 : vector<16x32xf32>
    %119 = arith.addf %115, %118 : vector<16x32xf32>
    %120 = vector.extract_strided_slice %15 {offsets = [0, 1], sizes = [16, 31], strides = [1, 1]} : vector<16x32xf32> to vector<16x31xf32>
    %121 = vector.extract_strided_slice %15 {offsets = [0, 0], sizes = [16, 1], strides = [1, 1]} : vector<16x32xf32> to vector<16x1xf32>
    %122 = tpu.concatenate %120, %121 in 1 : vector<16x31xf32>, vector<16x1xf32> -> vector<16x32xf32>
    %c16 = arith.constant 16 : index
    %123 = memref.load %arg2[%c16] : memref<81xf32, #tpu.memory_space<smem>>
    %124 = vector.broadcast %123 : f32 to vector<16x32xf32>
    %125 = arith.mulf %124, %122 : vector<16x32xf32>
    %126 = arith.addf %119, %125 : vector<16x32xf32>
    %127 = vector.extract_strided_slice %15 {offsets = [0, 2], sizes = [16, 30], strides = [1, 1]} : vector<16x32xf32> to vector<16x30xf32>
    %128 = vector.extract_strided_slice %15 {offsets = [0, 0], sizes = [16, 2], strides = [1, 1]} : vector<16x32xf32> to vector<16x2xf32>
    %129 = tpu.concatenate %127, %128 in 1 : vector<16x30xf32>, vector<16x2xf32> -> vector<16x32xf32>
    %c17 = arith.constant 17 : index
    %130 = memref.load %arg2[%c17] : memref<81xf32, #tpu.memory_space<smem>>
    %131 = vector.broadcast %130 : f32 to vector<16x32xf32>
    %132 = arith.mulf %131, %129 : vector<16x32xf32>
    %133 = arith.addf %126, %132 : vector<16x32xf32>
    %c18 = arith.constant 18 : index
    %134 = memref.load %arg2[%c18] : memref<81xf32, #tpu.memory_space<smem>>
    %135 = vector.broadcast %134 : f32 to vector<16x32xf32>
    %136 = arith.mulf %135, %17 : vector<16x32xf32>
    %137 = arith.addf %133, %136 : vector<16x32xf32>
    %138 = vector.extract_strided_slice %17 {offsets = [0, 1], sizes = [16, 31], strides = [1, 1]} : vector<16x32xf32> to vector<16x31xf32>
    %139 = vector.extract_strided_slice %17 {offsets = [0, 0], sizes = [16, 1], strides = [1, 1]} : vector<16x32xf32> to vector<16x1xf32>
    %140 = tpu.concatenate %138, %139 in 1 : vector<16x31xf32>, vector<16x1xf32> -> vector<16x32xf32>
    %c19 = arith.constant 19 : index
    %141 = memref.load %arg2[%c19] : memref<81xf32, #tpu.memory_space<smem>>
    %142 = vector.broadcast %141 : f32 to vector<16x32xf32>
    %143 = arith.mulf %142, %140 : vector<16x32xf32>
    %144 = arith.addf %137, %143 : vector<16x32xf32>
    %145 = vector.extract_strided_slice %17 {offsets = [0, 2], sizes = [16, 30], strides = [1, 1]} : vector<16x32xf32> to vector<16x30xf32>
    %146 = vector.extract_strided_slice %17 {offsets = [0, 0], sizes = [16, 2], strides = [1, 1]} : vector<16x32xf32> to vector<16x2xf32>
    %147 = tpu.concatenate %145, %146 in 1 : vector<16x30xf32>, vector<16x2xf32> -> vector<16x32xf32>
    %c20 = arith.constant 20 : index
    %148 = memref.load %arg2[%c20] : memref<81xf32, #tpu.memory_space<smem>>
    %149 = vector.broadcast %148 : f32 to vector<16x32xf32>
    %150 = arith.mulf %149, %147 : vector<16x32xf32>
    %151 = arith.addf %144, %150 : vector<16x32xf32>
    %c21 = arith.constant 21 : index
    %152 = memref.load %arg2[%c21] : memref<81xf32, #tpu.memory_space<smem>>
    %153 = vector.broadcast %152 : f32 to vector<16x32xf32>
    %154 = arith.mulf %153, %20 : vector<16x32xf32>
    %155 = arith.addf %151, %154 : vector<16x32xf32>
    %156 = vector.extract_strided_slice %20 {offsets = [0, 1], sizes = [16, 31], strides = [1, 1]} : vector<16x32xf32> to vector<16x31xf32>
    %157 = vector.extract_strided_slice %20 {offsets = [0, 0], sizes = [16, 1], strides = [1, 1]} : vector<16x32xf32> to vector<16x1xf32>
    %158 = tpu.concatenate %156, %157 in 1 : vector<16x31xf32>, vector<16x1xf32> -> vector<16x32xf32>
    %c22 = arith.constant 22 : index
    %159 = memref.load %arg2[%c22] : memref<81xf32, #tpu.memory_space<smem>>
    %160 = vector.broadcast %159 : f32 to vector<16x32xf32>
    %161 = arith.mulf %160, %158 : vector<16x32xf32>
    %162 = arith.addf %155, %161 : vector<16x32xf32>
    %163 = vector.extract_strided_slice %20 {offsets = [0, 2], sizes = [16, 30], strides = [1, 1]} : vector<16x32xf32> to vector<16x30xf32>
    %164 = vector.extract_strided_slice %20 {offsets = [0, 0], sizes = [16, 2], strides = [1, 1]} : vector<16x32xf32> to vector<16x2xf32>
    %165 = tpu.concatenate %163, %164 in 1 : vector<16x30xf32>, vector<16x2xf32> -> vector<16x32xf32>
    %c23 = arith.constant 23 : index
    %166 = memref.load %arg2[%c23] : memref<81xf32, #tpu.memory_space<smem>>
    %167 = vector.broadcast %166 : f32 to vector<16x32xf32>
    %168 = arith.mulf %167, %165 : vector<16x32xf32>
    %169 = arith.addf %162, %168 : vector<16x32xf32>
    %c24 = arith.constant 24 : index
    %170 = memref.load %arg2[%c24] : memref<81xf32, #tpu.memory_space<smem>>
    %171 = vector.broadcast %170 : f32 to vector<16x32xf32>
    %172 = arith.mulf %171, %23 : vector<16x32xf32>
    %173 = arith.addf %169, %172 : vector<16x32xf32>
    %174 = vector.extract_strided_slice %23 {offsets = [0, 1], sizes = [16, 31], strides = [1, 1]} : vector<16x32xf32> to vector<16x31xf32>
    %175 = vector.extract_strided_slice %23 {offsets = [0, 0], sizes = [16, 1], strides = [1, 1]} : vector<16x32xf32> to vector<16x1xf32>
    %176 = tpu.concatenate %174, %175 in 1 : vector<16x31xf32>, vector<16x1xf32> -> vector<16x32xf32>
    %c25 = arith.constant 25 : index
    %177 = memref.load %arg2[%c25] : memref<81xf32, #tpu.memory_space<smem>>
    %178 = vector.broadcast %177 : f32 to vector<16x32xf32>
    %179 = arith.mulf %178, %176 : vector<16x32xf32>
    %180 = arith.addf %173, %179 : vector<16x32xf32>
    %181 = vector.extract_strided_slice %23 {offsets = [0, 2], sizes = [16, 30], strides = [1, 1]} : vector<16x32xf32> to vector<16x30xf32>
    %182 = vector.extract_strided_slice %23 {offsets = [0, 0], sizes = [16, 2], strides = [1, 1]} : vector<16x32xf32> to vector<16x2xf32>
    %183 = tpu.concatenate %181, %182 in 1 : vector<16x30xf32>, vector<16x2xf32> -> vector<16x32xf32>
    %c26 = arith.constant 26 : index
    %184 = memref.load %arg2[%c26] : memref<81xf32, #tpu.memory_space<smem>>
    %185 = vector.broadcast %184 : f32 to vector<16x32xf32>
    %186 = arith.mulf %185, %183 : vector<16x32xf32>
    %187 = arith.addf %180, %186 : vector<16x32xf32>
    %188 = vector.extract_strided_slice %187 {offsets = [0, 0], sizes = [14, 14], strides = [1, 1]} : vector<16x32xf32> to vector<14x14xf32>
    %c0_13 = arith.constant 0 : index
    %c0_14 = arith.constant 0 : index
    %c0_15 = arith.constant 0 : index
    %c0_16 = arith.constant 0 : index
    %189 = vector.load %arg4[%c0_13, %c0_14, %c0_15, %c0_16] : memref<2x3x14x14xf32, #tpu.memory_space<vmem>>, vector<1x1x14x14xf32>
    %190 = vector.shape_cast %189 : vector<1x1x14x14xf32> to vector<14x14xf32>
    %191 = vector.shape_cast %188 : vector<14x14xf32> to vector<1x1x14x14xf32>
    tpu.vector_store %arg4[%c0_13, %c0_14, %c0_15, %c0_16], %191 {strides = array<i32>} : memref<2x3x14x14xf32, #tpu.memory_space<vmem>>, vector<1x1x14x14xf32>,
    %192 = vector.extract_strided_slice %187 {offsets = [0, 16], sizes = [14, 14], strides = [1, 1]} : vector<16x32xf32> to vector<14x14xf32>
    %c1_17 = arith.constant 1 : index
    %c0_18 = arith.constant 0 : index
    %c0_19 = arith.constant 0 : index
    %c0_20 = arith.constant 0 : index
    %193 = vector.load %arg4[%c1_17, %c0_18, %c0_19, %c0_20] : memref<2x3x14x14xf32, #tpu.memory_space<vmem>>, vector<1x1x14x14xf32>
    %194 = vector.shape_cast %193 : vector<1x1x14x14xf32> to vector<14x14xf32>
    %195 = vector.shape_cast %192 : vector<14x14xf32> to vector<1x1x14x14xf32>
    tpu.vector_store %arg4[%c1_17, %c0_18, %c0_19, %c0_20], %195 {strides = array<i32>} : memref<2x3x14x14xf32, #tpu.memory_space<vmem>>, vector<1x1x14x14xf32>,
    %c1_21 = arith.constant 1 : index
    %196 = memref.load %arg3[%c1_21] : memref<3xf32, #tpu.memory_space<smem>>
    %197 = vector.broadcast %196 : f32 to vector<16x32xf32>
    %c27 = arith.constant 27 : index
    %198 = memref.load %arg2[%c27] : memref<81xf32, #tpu.memory_space<smem>>
    %199 = vector.broadcast %198 : f32 to vector<16x32xf32>
    %200 = arith.mulf %199, %1 : vector<16x32xf32>
    %201 = arith.addf %197, %200 : vector<16x32xf32>
    %202 = vector.extract_strided_slice %1 {offsets = [0, 1], sizes = [16, 31], strides = [1, 1]} : vector<16x32xf32> to vector<16x31xf32>
    %203 = vector.extract_strided_slice %1 {offsets = [0, 0], sizes = [16, 1], strides = [1, 1]} : vector<16x32xf32> to vector<16x1xf32>
    %204 = tpu.concatenate %202, %203 in 1 : vector<16x31xf32>, vector<16x1xf32> -> vector<16x32xf32>
    %c28 = arith.constant 28 : index
    %205 = memref.load %arg2[%c28] : memref<81xf32, #tpu.memory_space<smem>>
    %206 = vector.broadcast %205 : f32 to vector<16x32xf32>
    %207 = arith.mulf %206, %204 : vector<16x32xf32>
    %208 = arith.addf %201, %207 : vector<16x32xf32>
    %209 = vector.extract_strided_slice %1 {offsets = [0, 2], sizes = [16, 30], strides = [1, 1]} : vector<16x32xf32> to vector<16x30xf32>
    %210 = vector.extract_strided_slice %1 {offsets = [0, 0], sizes = [16, 2], strides = [1, 1]} : vector<16x32xf32> to vector<16x2xf32>
    %211 = tpu.concatenate %209, %210 in 1 : vector<16x30xf32>, vector<16x2xf32> -> vector<16x32xf32>
    %c29 = arith.constant 29 : index
    %212 = memref.load %arg2[%c29] : memref<81xf32, #tpu.memory_space<smem>>
    %213 = vector.broadcast %212 : f32 to vector<16x32xf32>
    %214 = arith.mulf %213, %211 : vector<16x32xf32>
    %215 = arith.addf %208, %214 : vector<16x32xf32>
    %c30 = arith.constant 30 : index
    %216 = memref.load %arg2[%c30] : memref<81xf32, #tpu.memory_space<smem>>
    %217 = vector.broadcast %216 : f32 to vector<16x32xf32>
    %218 = arith.mulf %217, %4 : vector<16x32xf32>
    %219 = arith.addf %215, %218 : vector<16x32xf32>
    %220 = vector.extract_strided_slice %4 {offsets = [0, 1], sizes = [16, 31], strides = [1, 1]} : vector<16x32xf32> to vector<16x31xf32>
    %221 = vector.extract_strided_slice %4 {offsets = [0, 0], sizes = [16, 1], strides = [1, 1]} : vector<16x32xf32> to vector<16x1xf32>
    %222 = tpu.concatenate %220, %221 in 1 : vector<16x31xf32>, vector<16x1xf32> -> vector<16x32xf32>
    %c31 = arith.constant 31 : index
    %223 = memref.load %arg2[%c31] : memref<81xf32, #tpu.memory_space<smem>>
    %224 = vector.broadcast %223 : f32 to vector<16x32xf32>
    %225 = arith.mulf %224, %222 : vector<16x32xf32>
    %226 = arith.addf %219, %225 : vector<16x32xf32>
    %227 = vector.extract_strided_slice %4 {offsets = [0, 2], sizes = [16, 30], strides = [1, 1]} : vector<16x32xf32> to vector<16x30xf32>
    %228 = vector.extract_strided_slice %4 {offsets = [0, 0], sizes = [16, 2], strides = [1, 1]} : vector<16x32xf32> to vector<16x2xf32>
    %229 = tpu.concatenate %227, %228 in 1 : vector<16x30xf32>, vector<16x2xf32> -> vector<16x32xf32>
    %c32 = arith.constant 32 : index
    %230 = memref.load %arg2[%c32] : memref<81xf32, #tpu.memory_space<smem>>
    %231 = vector.broadcast %230 : f32 to vector<16x32xf32>
    %232 = arith.mulf %231, %229 : vector<16x32xf32>
    %233 = arith.addf %226, %232 : vector<16x32xf32>
    %c33 = arith.constant 33 : index
    %234 = memref.load %arg2[%c33] : memref<81xf32, #tpu.memory_space<smem>>
    %235 = vector.broadcast %234 : f32 to vector<16x32xf32>
    %236 = arith.mulf %235, %7 : vector<16x32xf32>
    %237 = arith.addf %233, %236 : vector<16x32xf32>
    %238 = vector.extract_strided_slice %7 {offsets = [0, 1], sizes = [16, 31], strides = [1, 1]} : vector<16x32xf32> to vector<16x31xf32>
    %239 = vector.extract_strided_slice %7 {offsets = [0, 0], sizes = [16, 1], strides = [1, 1]} : vector<16x32xf32> to vector<16x1xf32>
    %240 = tpu.concatenate %238, %239 in 1 : vector<16x31xf32>, vector<16x1xf32> -> vector<16x32xf32>
    %c34 = arith.constant 34 : index
    %241 = memref.load %arg2[%c34] : memref<81xf32, #tpu.memory_space<smem>>
    %242 = vector.broadcast %241 : f32 to vector<16x32xf32>
    %243 = arith.mulf %242, %240 : vector<16x32xf32>
    %244 = arith.addf %237, %243 : vector<16x32xf32>
    %245 = vector.extract_strided_slice %7 {offsets = [0, 2], sizes = [16, 30], strides = [1, 1]} : vector<16x32xf32> to vector<16x30xf32>
    %246 = vector.extract_strided_slice %7 {offsets = [0, 0], sizes = [16, 2], strides = [1, 1]} : vector<16x32xf32> to vector<16x2xf32>
    %247 = tpu.concatenate %245, %246 in 1 : vector<16x30xf32>, vector<16x2xf32> -> vector<16x32xf32>
    %c35 = arith.constant 35 : index
    %248 = memref.load %arg2[%c35] : memref<81xf32, #tpu.memory_space<smem>>
    %249 = vector.broadcast %248 : f32 to vector<16x32xf32>
    %250 = arith.mulf %249, %247 : vector<16x32xf32>
    %251 = arith.addf %244, %250 : vector<16x32xf32>
    %c36 = arith.constant 36 : index
    %252 = memref.load %arg2[%c36] : memref<81xf32, #tpu.memory_space<smem>>
    %253 = vector.broadcast %252 : f32 to vector<16x32xf32>
    %254 = arith.mulf %253, %9 : vector<16x32xf32>
    %255 = arith.addf %251, %254 : vector<16x32xf32>
    %256 = vector.extract_strided_slice %9 {offsets = [0, 1], sizes = [16, 31], strides = [1, 1]} : vector<16x32xf32> to vector<16x31xf32>
    %257 = vector.extract_strided_slice %9 {offsets = [0, 0], sizes = [16, 1], strides = [1, 1]} : vector<16x32xf32> to vector<16x1xf32>
    %258 = tpu.concatenate %256, %257 in 1 : vector<16x31xf32>, vector<16x1xf32> -> vector<16x32xf32>
    %c37 = arith.constant 37 : index
    %259 = memref.load %arg2[%c37] : memref<81xf32, #tpu.memory_space<smem>>
    %260 = vector.broadcast %259 : f32 to vector<16x32xf32>
    %261 = arith.mulf %260, %258 : vector<16x32xf32>
    %262 = arith.addf %255, %261 : vector<16x32xf32>
    %263 = vector.extract_strided_slice %9 {offsets = [0, 2], sizes = [16, 30], strides = [1, 1]} : vector<16x32xf32> to vector<16x30xf32>
    %264 = vector.extract_strided_slice %9 {offsets = [0, 0], sizes = [16, 2], strides = [1, 1]} : vector<16x32xf32> to vector<16x2xf32>
    %265 = tpu.concatenate %263, %264 in 1 : vector<16x30xf32>, vector<16x2xf32> -> vector<16x32xf32>
    %c38 = arith.constant 38 : index
    %266 = memref.load %arg2[%c38] : memref<81xf32, #tpu.memory_space<smem>>
    %267 = vector.broadcast %266 : f32 to vector<16x32xf32>
    %268 = arith.mulf %267, %265 : vector<16x32xf32>
    %269 = arith.addf %262, %268 : vector<16x32xf32>
    %c39 = arith.constant 39 : index
    %270 = memref.load %arg2[%c39] : memref<81xf32, #tpu.memory_space<smem>>
    %271 = vector.broadcast %270 : f32 to vector<16x32xf32>
    %272 = arith.mulf %271, %12 : vector<16x32xf32>
    %273 = arith.addf %269, %272 : vector<16x32xf32>
    %274 = vector.extract_strided_slice %12 {offsets = [0, 1], sizes = [16, 31], strides = [1, 1]} : vector<16x32xf32> to vector<16x31xf32>
    %275 = vector.extract_strided_slice %12 {offsets = [0, 0], sizes = [16, 1], strides = [1, 1]} : vector<16x32xf32> to vector<16x1xf32>
    %276 = tpu.concatenate %274, %275 in 1 : vector<16x31xf32>, vector<16x1xf32> -> vector<16x32xf32>
    %c40 = arith.constant 40 : index
    %277 = memref.load %arg2[%c40] : memref<81xf32, #tpu.memory_space<smem>>
    %278 = vector.broadcast %277 : f32 to vector<16x32xf32>
    %279 = arith.mulf %278, %276 : vector<16x32xf32>
    %280 = arith.addf %273, %279 : vector<16x32xf32>
    %281 = vector.extract_strided_slice %12 {offsets = [0, 2], sizes = [16, 30], strides = [1, 1]} : vector<16x32xf32> to vector<16x30xf32>
    %282 = vector.extract_strided_slice %12 {offsets = [0, 0], sizes = [16, 2], strides = [1, 1]} : vector<16x32xf32> to vector<16x2xf32>
    %283 = tpu.concatenate %281, %282 in 1 : vector<16x30xf32>, vector<16x2xf32> -> vector<16x32xf32>
    %c41 = arith.constant 41 : index
    %284 = memref.load %arg2[%c41] : memref<81xf32, #tpu.memory_space<smem>>
    %285 = vector.broadcast %284 : f32 to vector<16x32xf32>
    %286 = arith.mulf %285, %283 : vector<16x32xf32>
    %287 = arith.addf %280, %286 : vector<16x32xf32>
    %c42 = arith.constant 42 : index
    %288 = memref.load %arg2[%c42] : memref<81xf32, #tpu.memory_space<smem>>
    %289 = vector.broadcast %288 : f32 to vector<16x32xf32>
    %290 = arith.mulf %289, %15 : vector<16x32xf32>
    %291 = arith.addf %287, %290 : vector<16x32xf32>
    %292 = vector.extract_strided_slice %15 {offsets = [0, 1], sizes = [16, 31], strides = [1, 1]} : vector<16x32xf32> to vector<16x31xf32>
    %293 = vector.extract_strided_slice %15 {offsets = [0, 0], sizes = [16, 1], strides = [1, 1]} : vector<16x32xf32> to vector<16x1xf32>
    %294 = tpu.concatenate %292, %293 in 1 : vector<16x31xf32>, vector<16x1xf32> -> vector<16x32xf32>
    %c43 = arith.constant 43 : index
    %295 = memref.load %arg2[%c43] : memref<81xf32, #tpu.memory_space<smem>>
    %296 = vector.broadcast %295 : f32 to vector<16x32xf32>
    %297 = arith.mulf %296, %294 : vector<16x32xf32>
    %298 = arith.addf %291, %297 : vector<16x32xf32>
    %299 = vector.extract_strided_slice %15 {offsets = [0, 2], sizes = [16, 30], strides = [1, 1]} : vector<16x32xf32> to vector<16x30xf32>
    %300 = vector.extract_strided_slice %15 {offsets = [0, 0], sizes = [16, 2], strides = [1, 1]} : vector<16x32xf32> to vector<16x2xf32>
    %301 = tpu.concatenate %299, %300 in 1 : vector<16x30xf32>, vector<16x2xf32> -> vector<16x32xf32>
    %c44 = arith.constant 44 : index
    %302 = memref.load %arg2[%c44] : memref<81xf32, #tpu.memory_space<smem>>
    %303 = vector.broadcast %302 : f32 to vector<16x32xf32>
    %304 = arith.mulf %303, %301 : vector<16x32xf32>
    %305 = arith.addf %298, %304 : vector<16x32xf32>
    %c45 = arith.constant 45 : index
    %306 = memref.load %arg2[%c45] : memref<81xf32, #tpu.memory_space<smem>>
    %307 = vector.broadcast %306 : f32 to vector<16x32xf32>
    %308 = arith.mulf %307, %17 : vector<16x32xf32>
    %309 = arith.addf %305, %308 : vector<16x32xf32>
    %310 = vector.extract_strided_slice %17 {offsets = [0, 1], sizes = [16, 31], strides = [1, 1]} : vector<16x32xf32> to vector<16x31xf32>
    %311 = vector.extract_strided_slice %17 {offsets = [0, 0], sizes = [16, 1], strides = [1, 1]} : vector<16x32xf32> to vector<16x1xf32>
    %312 = tpu.concatenate %310, %311 in 1 : vector<16x31xf32>, vector<16x1xf32> -> vector<16x32xf32>
    %c46 = arith.constant 46 : index
    %313 = memref.load %arg2[%c46] : memref<81xf32, #tpu.memory_space<smem>>
    %314 = vector.broadcast %313 : f32 to vector<16x32xf32>
    %315 = arith.mulf %314, %312 : vector<16x32xf32>
    %316 = arith.addf %309, %315 : vector<16x32xf32>
    %317 = vector.extract_strided_slice %17 {offsets = [0, 2], sizes = [16, 30], strides = [1, 1]} : vector<16x32xf32> to vector<16x30xf32>
    %318 = vector.extract_strided_slice %17 {offsets = [0, 0], sizes = [16, 2], strides = [1, 1]} : vector<16x32xf32> to vector<16x2xf32>
    %319 = tpu.concatenate %317, %318 in 1 : vector<16x30xf32>, vector<16x2xf32> -> vector<16x32xf32>
    %c47 = arith.constant 47 : index
    %320 = memref.load %arg2[%c47] : memref<81xf32, #tpu.memory_space<smem>>
    %321 = vector.broadcast %320 : f32 to vector<16x32xf32>
    %322 = arith.mulf %321, %319 : vector<16x32xf32>
    %323 = arith.addf %316, %322 : vector<16x32xf32>
    %c48 = arith.constant 48 : index
    %324 = memref.load %arg2[%c48] : memref<81xf32, #tpu.memory_space<smem>>
    %325 = vector.broadcast %324 : f32 to vector<16x32xf32>
    %326 = arith.mulf %325, %20 : vector<16x32xf32>
    %327 = arith.addf %323, %326 : vector<16x32xf32>
    %328 = vector.extract_strided_slice %20 {offsets = [0, 1], sizes = [16, 31], strides = [1, 1]} : vector<16x32xf32> to vector<16x31xf32>
    %329 = vector.extract_strided_slice %20 {offsets = [0, 0], sizes = [16, 1], strides = [1, 1]} : vector<16x32xf32> to vector<16x1xf32>
    %330 = tpu.concatenate %328, %329 in 1 : vector<16x31xf32>, vector<16x1xf32> -> vector<16x32xf32>
    %c49 = arith.constant 49 : index
    %331 = memref.load %arg2[%c49] : memref<81xf32, #tpu.memory_space<smem>>
    %332 = vector.broadcast %331 : f32 to vector<16x32xf32>
    %333 = arith.mulf %332, %330 : vector<16x32xf32>
    %334 = arith.addf %327, %333 : vector<16x32xf32>
    %335 = vector.extract_strided_slice %20 {offsets = [0, 2], sizes = [16, 30], strides = [1, 1]} : vector<16x32xf32> to vector<16x30xf32>
    %336 = vector.extract_strided_slice %20 {offsets = [0, 0], sizes = [16, 2], strides = [1, 1]} : vector<16x32xf32> to vector<16x2xf32>
    %337 = tpu.concatenate %335, %336 in 1 : vector<16x30xf32>, vector<16x2xf32> -> vector<16x32xf32>
    %c50 = arith.constant 50 : index
    %338 = memref.load %arg2[%c50] : memref<81xf32, #tpu.memory_space<smem>>
    %339 = vector.broadcast %338 : f32 to vector<16x32xf32>
    %340 = arith.mulf %339, %337 : vector<16x32xf32>
    %341 = arith.addf %334, %340 : vector<16x32xf32>
    %c51 = arith.constant 51 : index
    %342 = memref.load %arg2[%c51] : memref<81xf32, #tpu.memory_space<smem>>
    %343 = vector.broadcast %342 : f32 to vector<16x32xf32>
    %344 = arith.mulf %343, %23 : vector<16x32xf32>
    %345 = arith.addf %341, %344 : vector<16x32xf32>
    %346 = vector.extract_strided_slice %23 {offsets = [0, 1], sizes = [16, 31], strides = [1, 1]} : vector<16x32xf32> to vector<16x31xf32>
    %347 = vector.extract_strided_slice %23 {offsets = [0, 0], sizes = [16, 1], strides = [1, 1]} : vector<16x32xf32> to vector<16x1xf32>
    %348 = tpu.concatenate %346, %347 in 1 : vector<16x31xf32>, vector<16x1xf32> -> vector<16x32xf32>
    %c52 = arith.constant 52 : index
    %349 = memref.load %arg2[%c52] : memref<81xf32, #tpu.memory_space<smem>>
    %350 = vector.broadcast %349 : f32 to vector<16x32xf32>
    %351 = arith.mulf %350, %348 : vector<16x32xf32>
    %352 = arith.addf %345, %351 : vector<16x32xf32>
    %353 = vector.extract_strided_slice %23 {offsets = [0, 2], sizes = [16, 30], strides = [1, 1]} : vector<16x32xf32> to vector<16x30xf32>
    %354 = vector.extract_strided_slice %23 {offsets = [0, 0], sizes = [16, 2], strides = [1, 1]} : vector<16x32xf32> to vector<16x2xf32>
    %355 = tpu.concatenate %353, %354 in 1 : vector<16x30xf32>, vector<16x2xf32> -> vector<16x32xf32>
    %c53 = arith.constant 53 : index
    %356 = memref.load %arg2[%c53] : memref<81xf32, #tpu.memory_space<smem>>
    %357 = vector.broadcast %356 : f32 to vector<16x32xf32>
    %358 = arith.mulf %357, %355 : vector<16x32xf32>
    %359 = arith.addf %352, %358 : vector<16x32xf32>
    %360 = vector.extract_strided_slice %359 {offsets = [0, 0], sizes = [14, 14], strides = [1, 1]} : vector<16x32xf32> to vector<14x14xf32>
    %c0_22 = arith.constant 0 : index
    %c1_23 = arith.constant 1 : index
    %c0_24 = arith.constant 0 : index
    %c0_25 = arith.constant 0 : index
    %361 = vector.load %arg4[%c0_22, %c1_23, %c0_24, %c0_25] : memref<2x3x14x14xf32, #tpu.memory_space<vmem>>, vector<1x1x14x14xf32>
    %362 = vector.shape_cast %361 : vector<1x1x14x14xf32> to vector<14x14xf32>
    %363 = vector.shape_cast %360 : vector<14x14xf32> to vector<1x1x14x14xf32>
    tpu.vector_store %arg4[%c0_22, %c1_23, %c0_24, %c0_25], %363 {strides = array<i32>} : memref<2x3x14x14xf32, #tpu.memory_space<vmem>>, vector<1x1x14x14xf32>,
    %364 = vector.extract_strided_slice %359 {offsets = [0, 16], sizes = [14, 14], strides = [1, 1]} : vector<16x32xf32> to vector<14x14xf32>
    %c1_26 = arith.constant 1 : index
    %c1_27 = arith.constant 1 : index
    %c0_28 = arith.constant 0 : index
    %c0_29 = arith.constant 0 : index
    %365 = vector.load %arg4[%c1_26, %c1_27, %c0_28, %c0_29] : memref<2x3x14x14xf32, #tpu.memory_space<vmem>>, vector<1x1x14x14xf32>
    %366 = vector.shape_cast %365 : vector<1x1x14x14xf32> to vector<14x14xf32>
    %367 = vector.shape_cast %364 : vector<14x14xf32> to vector<1x1x14x14xf32>
    tpu.vector_store %arg4[%c1_26, %c1_27, %c0_28, %c0_29], %367 {strides = array<i32>} : memref<2x3x14x14xf32, #tpu.memory_space<vmem>>, vector<1x1x14x14xf32>,
    %c2_30 = arith.constant 2 : index
    %368 = memref.load %arg3[%c2_30] : memref<3xf32, #tpu.memory_space<smem>>
    %369 = vector.broadcast %368 : f32 to vector<16x32xf32>
    %c54 = arith.constant 54 : index
    %370 = memref.load %arg2[%c54] : memref<81xf32, #tpu.memory_space<smem>>
    %371 = vector.broadcast %370 : f32 to vector<16x32xf32>
    %372 = arith.mulf %371, %1 : vector<16x32xf32>
    %373 = arith.addf %369, %372 : vector<16x32xf32>
    %374 = vector.extract_strided_slice %1 {offsets = [0, 1], sizes = [16, 31], strides = [1, 1]} : vector<16x32xf32> to vector<16x31xf32>
    %375 = vector.extract_strided_slice %1 {offsets = [0, 0], sizes = [16, 1], strides = [1, 1]} : vector<16x32xf32> to vector<16x1xf32>
    %376 = tpu.concatenate %374, %375 in 1 : vector<16x31xf32>, vector<16x1xf32> -> vector<16x32xf32>
    %c55 = arith.constant 55 : index
    %377 = memref.load %arg2[%c55] : memref<81xf32, #tpu.memory_space<smem>>
    %378 = vector.broadcast %377 : f32 to vector<16x32xf32>
    %379 = arith.mulf %378, %376 : vector<16x32xf32>
    %380 = arith.addf %373, %379 : vector<16x32xf32>
    %381 = vector.extract_strided_slice %1 {offsets = [0, 2], sizes = [16, 30], strides = [1, 1]} : vector<16x32xf32> to vector<16x30xf32>
    %382 = vector.extract_strided_slice %1 {offsets = [0, 0], sizes = [16, 2], strides = [1, 1]} : vector<16x32xf32> to vector<16x2xf32>
    %383 = tpu.concatenate %381, %382 in 1 : vector<16x30xf32>, vector<16x2xf32> -> vector<16x32xf32>
    %c56 = arith.constant 56 : index
    %384 = memref.load %arg2[%c56] : memref<81xf32, #tpu.memory_space<smem>>
    %385 = vector.broadcast %384 : f32 to vector<16x32xf32>
    %386 = arith.mulf %385, %383 : vector<16x32xf32>
    %387 = arith.addf %380, %386 : vector<16x32xf32>
    %c57 = arith.constant 57 : index
    %388 = memref.load %arg2[%c57] : memref<81xf32, #tpu.memory_space<smem>>
    %389 = vector.broadcast %388 : f32 to vector<16x32xf32>
    %390 = arith.mulf %389, %4 : vector<16x32xf32>
    %391 = arith.addf %387, %390 : vector<16x32xf32>
    %392 = vector.extract_strided_slice %4 {offsets = [0, 1], sizes = [16, 31], strides = [1, 1]} : vector<16x32xf32> to vector<16x31xf32>
    %393 = vector.extract_strided_slice %4 {offsets = [0, 0], sizes = [16, 1], strides = [1, 1]} : vector<16x32xf32> to vector<16x1xf32>
    %394 = tpu.concatenate %392, %393 in 1 : vector<16x31xf32>, vector<16x1xf32> -> vector<16x32xf32>
    %c58 = arith.constant 58 : index
    %395 = memref.load %arg2[%c58] : memref<81xf32, #tpu.memory_space<smem>>
    %396 = vector.broadcast %395 : f32 to vector<16x32xf32>
    %397 = arith.mulf %396, %394 : vector<16x32xf32>
    %398 = arith.addf %391, %397 : vector<16x32xf32>
    %399 = vector.extract_strided_slice %4 {offsets = [0, 2], sizes = [16, 30], strides = [1, 1]} : vector<16x32xf32> to vector<16x30xf32>
    %400 = vector.extract_strided_slice %4 {offsets = [0, 0], sizes = [16, 2], strides = [1, 1]} : vector<16x32xf32> to vector<16x2xf32>
    %401 = tpu.concatenate %399, %400 in 1 : vector<16x30xf32>, vector<16x2xf32> -> vector<16x32xf32>
    %c59 = arith.constant 59 : index
    %402 = memref.load %arg2[%c59] : memref<81xf32, #tpu.memory_space<smem>>
    %403 = vector.broadcast %402 : f32 to vector<16x32xf32>
    %404 = arith.mulf %403, %401 : vector<16x32xf32>
    %405 = arith.addf %398, %404 : vector<16x32xf32>
    %c60 = arith.constant 60 : index
    %406 = memref.load %arg2[%c60] : memref<81xf32, #tpu.memory_space<smem>>
    %407 = vector.broadcast %406 : f32 to vector<16x32xf32>
    %408 = arith.mulf %407, %7 : vector<16x32xf32>
    %409 = arith.addf %405, %408 : vector<16x32xf32>
    %410 = vector.extract_strided_slice %7 {offsets = [0, 1], sizes = [16, 31], strides = [1, 1]} : vector<16x32xf32> to vector<16x31xf32>
    %411 = vector.extract_strided_slice %7 {offsets = [0, 0], sizes = [16, 1], strides = [1, 1]} : vector<16x32xf32> to vector<16x1xf32>
    %412 = tpu.concatenate %410, %411 in 1 : vector<16x31xf32>, vector<16x1xf32> -> vector<16x32xf32>
    %c61 = arith.constant 61 : index
    %413 = memref.load %arg2[%c61] : memref<81xf32, #tpu.memory_space<smem>>
    %414 = vector.broadcast %413 : f32 to vector<16x32xf32>
    %415 = arith.mulf %414, %412 : vector<16x32xf32>
    %416 = arith.addf %409, %415 : vector<16x32xf32>
    %417 = vector.extract_strided_slice %7 {offsets = [0, 2], sizes = [16, 30], strides = [1, 1]} : vector<16x32xf32> to vector<16x30xf32>
    %418 = vector.extract_strided_slice %7 {offsets = [0, 0], sizes = [16, 2], strides = [1, 1]} : vector<16x32xf32> to vector<16x2xf32>
    %419 = tpu.concatenate %417, %418 in 1 : vector<16x30xf32>, vector<16x2xf32> -> vector<16x32xf32>
    %c62 = arith.constant 62 : index
    %420 = memref.load %arg2[%c62] : memref<81xf32, #tpu.memory_space<smem>>
    %421 = vector.broadcast %420 : f32 to vector<16x32xf32>
    %422 = arith.mulf %421, %419 : vector<16x32xf32>
    %423 = arith.addf %416, %422 : vector<16x32xf32>
    %c63 = arith.constant 63 : index
    %424 = memref.load %arg2[%c63] : memref<81xf32, #tpu.memory_space<smem>>
    %425 = vector.broadcast %424 : f32 to vector<16x32xf32>
    %426 = arith.mulf %425, %9 : vector<16x32xf32>
    %427 = arith.addf %423, %426 : vector<16x32xf32>
    %428 = vector.extract_strided_slice %9 {offsets = [0, 1], sizes = [16, 31], strides = [1, 1]} : vector<16x32xf32> to vector<16x31xf32>
    %429 = vector.extract_strided_slice %9 {offsets = [0, 0], sizes = [16, 1], strides = [1, 1]} : vector<16x32xf32> to vector<16x1xf32>
    %430 = tpu.concatenate %428, %429 in 1 : vector<16x31xf32>, vector<16x1xf32> -> vector<16x32xf32>
    %c64 = arith.constant 64 : index
    %431 = memref.load %arg2[%c64] : memref<81xf32, #tpu.memory_space<smem>>
    %432 = vector.broadcast %431 : f32 to vector<16x32xf32>
    %433 = arith.mulf %432, %430 : vector<16x32xf32>
    %434 = arith.addf %427, %433 : vector<16x32xf32>
    %435 = vector.extract_strided_slice %9 {offsets = [0, 2], sizes = [16, 30], strides = [1, 1]} : vector<16x32xf32> to vector<16x30xf32>
    %436 = vector.extract_strided_slice %9 {offsets = [0, 0], sizes = [16, 2], strides = [1, 1]} : vector<16x32xf32> to vector<16x2xf32>
    %437 = tpu.concatenate %435, %436 in 1 : vector<16x30xf32>, vector<16x2xf32> -> vector<16x32xf32>
    %c65 = arith.constant 65 : index
    %438 = memref.load %arg2[%c65] : memref<81xf32, #tpu.memory_space<smem>>
    %439 = vector.broadcast %438 : f32 to vector<16x32xf32>
    %440 = arith.mulf %439, %437 : vector<16x32xf32>
    %441 = arith.addf %434, %440 : vector<16x32xf32>
    %c66 = arith.constant 66 : index
    %442 = memref.load %arg2[%c66] : memref<81xf32, #tpu.memory_space<smem>>
    %443 = vector.broadcast %442 : f32 to vector<16x32xf32>
    %444 = arith.mulf %443, %12 : vector<16x32xf32>
    %445 = arith.addf %441, %444 : vector<16x32xf32>
    %446 = vector.extract_strided_slice %12 {offsets = [0, 1], sizes = [16, 31], strides = [1, 1]} : vector<16x32xf32> to vector<16x31xf32>
    %447 = vector.extract_strided_slice %12 {offsets = [0, 0], sizes = [16, 1], strides = [1, 1]} : vector<16x32xf32> to vector<16x1xf32>
    %448 = tpu.concatenate %446, %447 in 1 : vector<16x31xf32>, vector<16x1xf32> -> vector<16x32xf32>
    %c67 = arith.constant 67 : index
    %449 = memref.load %arg2[%c67] : memref<81xf32, #tpu.memory_space<smem>>
    %450 = vector.broadcast %449 : f32 to vector<16x32xf32>
    %451 = arith.mulf %450, %448 : vector<16x32xf32>
    %452 = arith.addf %445, %451 : vector<16x32xf32>
    %453 = vector.extract_strided_slice %12 {offsets = [0, 2], sizes = [16, 30], strides = [1, 1]} : vector<16x32xf32> to vector<16x30xf32>
    %454 = vector.extract_strided_slice %12 {offsets = [0, 0], sizes = [16, 2], strides = [1, 1]} : vector<16x32xf32> to vector<16x2xf32>
    %455 = tpu.concatenate %453, %454 in 1 : vector<16x30xf32>, vector<16x2xf32> -> vector<16x32xf32>
    %c68 = arith.constant 68 : index
    %456 = memref.load %arg2[%c68] : memref<81xf32, #tpu.memory_space<smem>>
    %457 = vector.broadcast %456 : f32 to vector<16x32xf32>
    %458 = arith.mulf %457, %455 : vector<16x32xf32>
    %459 = arith.addf %452, %458 : vector<16x32xf32>
    %c69 = arith.constant 69 : index
    %460 = memref.load %arg2[%c69] : memref<81xf32, #tpu.memory_space<smem>>
    %461 = vector.broadcast %460 : f32 to vector<16x32xf32>
    %462 = arith.mulf %461, %15 : vector<16x32xf32>
    %463 = arith.addf %459, %462 : vector<16x32xf32>
    %464 = vector.extract_strided_slice %15 {offsets = [0, 1], sizes = [16, 31], strides = [1, 1]} : vector<16x32xf32> to vector<16x31xf32>
    %465 = vector.extract_strided_slice %15 {offsets = [0, 0], sizes = [16, 1], strides = [1, 1]} : vector<16x32xf32> to vector<16x1xf32>
    %466 = tpu.concatenate %464, %465 in 1 : vector<16x31xf32>, vector<16x1xf32> -> vector<16x32xf32>
    %c70 = arith.constant 70 : index
    %467 = memref.load %arg2[%c70] : memref<81xf32, #tpu.memory_space<smem>>
    %468 = vector.broadcast %467 : f32 to vector<16x32xf32>
    %469 = arith.mulf %468, %466 : vector<16x32xf32>
    %470 = arith.addf %463, %469 : vector<16x32xf32>
    %471 = vector.extract_strided_slice %15 {offsets = [0, 2], sizes = [16, 30], strides = [1, 1]} : vector<16x32xf32> to vector<16x30xf32>
    %472 = vector.extract_strided_slice %15 {offsets = [0, 0], sizes = [16, 2], strides = [1, 1]} : vector<16x32xf32> to vector<16x2xf32>
    %473 = tpu.concatenate %471, %472 in 1 : vector<16x30xf32>, vector<16x2xf32> -> vector<16x32xf32>
    %c71 = arith.constant 71 : index
    %474 = memref.load %arg2[%c71] : memref<81xf32, #tpu.memory_space<smem>>
    %475 = vector.broadcast %474 : f32 to vector<16x32xf32>
    %476 = arith.mulf %475, %473 : vector<16x32xf32>
    %477 = arith.addf %470, %476 : vector<16x32xf32>
    %c72 = arith.constant 72 : index
    %478 = memref.load %arg2[%c72] : memref<81xf32, #tpu.memory_space<smem>>
    %479 = vector.broadcast %478 : f32 to vector<16x32xf32>
    %480 = arith.mulf %479, %17 : vector<16x32xf32>
    %481 = arith.addf %477, %480 : vector<16x32xf32>
    %482 = vector.extract_strided_slice %17 {offsets = [0, 1], sizes = [16, 31], strides = [1, 1]} : vector<16x32xf32> to vector<16x31xf32>
    %483 = vector.extract_strided_slice %17 {offsets = [0, 0], sizes = [16, 1], strides = [1, 1]} : vector<16x32xf32> to vector<16x1xf32>
    %484 = tpu.concatenate %482, %483 in 1 : vector<16x31xf32>, vector<16x1xf32> -> vector<16x32xf32>
    %c73 = arith.constant 73 : index
    %485 = memref.load %arg2[%c73] : memref<81xf32, #tpu.memory_space<smem>>
    %486 = vector.broadcast %485 : f32 to vector<16x32xf32>
    %487 = arith.mulf %486, %484 : vector<16x32xf32>
    %488 = arith.addf %481, %487 : vector<16x32xf32>
    %489 = vector.extract_strided_slice %17 {offsets = [0, 2], sizes = [16, 30], strides = [1, 1]} : vector<16x32xf32> to vector<16x30xf32>
    %490 = vector.extract_strided_slice %17 {offsets = [0, 0], sizes = [16, 2], strides = [1, 1]} : vector<16x32xf32> to vector<16x2xf32>
    %491 = tpu.concatenate %489, %490 in 1 : vector<16x30xf32>, vector<16x2xf32> -> vector<16x32xf32>
    %c74 = arith.constant 74 : index
    %492 = memref.load %arg2[%c74] : memref<81xf32, #tpu.memory_space<smem>>
    %493 = vector.broadcast %492 : f32 to vector<16x32xf32>
    %494 = arith.mulf %493, %491 : vector<16x32xf32>
    %495 = arith.addf %488, %494 : vector<16x32xf32>
    %c75 = arith.constant 75 : index
    %496 = memref.load %arg2[%c75] : memref<81xf32, #tpu.memory_space<smem>>
    %497 = vector.broadcast %496 : f32 to vector<16x32xf32>
    %498 = arith.mulf %497, %20 : vector<16x32xf32>
    %499 = arith.addf %495, %498 : vector<16x32xf32>
    %500 = vector.extract_strided_slice %20 {offsets = [0, 1], sizes = [16, 31], strides = [1, 1]} : vector<16x32xf32> to vector<16x31xf32>
    %501 = vector.extract_strided_slice %20 {offsets = [0, 0], sizes = [16, 1], strides = [1, 1]} : vector<16x32xf32> to vector<16x1xf32>
    %502 = tpu.concatenate %500, %501 in 1 : vector<16x31xf32>, vector<16x1xf32> -> vector<16x32xf32>
    %c76 = arith.constant 76 : index
    %503 = memref.load %arg2[%c76] : memref<81xf32, #tpu.memory_space<smem>>
    %504 = vector.broadcast %503 : f32 to vector<16x32xf32>
    %505 = arith.mulf %504, %502 : vector<16x32xf32>
    %506 = arith.addf %499, %505 : vector<16x32xf32>
    %507 = vector.extract_strided_slice %20 {offsets = [0, 2], sizes = [16, 30], strides = [1, 1]} : vector<16x32xf32> to vector<16x30xf32>
    %508 = vector.extract_strided_slice %20 {offsets = [0, 0], sizes = [16, 2], strides = [1, 1]} : vector<16x32xf32> to vector<16x2xf32>
    %509 = tpu.concatenate %507, %508 in 1 : vector<16x30xf32>, vector<16x2xf32> -> vector<16x32xf32>
    %c77 = arith.constant 77 : index
    %510 = memref.load %arg2[%c77] : memref<81xf32, #tpu.memory_space<smem>>
    %511 = vector.broadcast %510 : f32 to vector<16x32xf32>
    %512 = arith.mulf %511, %509 : vector<16x32xf32>
    %513 = arith.addf %506, %512 : vector<16x32xf32>
    %c78 = arith.constant 78 : index
    %514 = memref.load %arg2[%c78] : memref<81xf32, #tpu.memory_space<smem>>
    %515 = vector.broadcast %514 : f32 to vector<16x32xf32>
    %516 = arith.mulf %515, %23 : vector<16x32xf32>
    %517 = arith.addf %513, %516 : vector<16x32xf32>
    %518 = vector.extract_strided_slice %23 {offsets = [0, 1], sizes = [16, 31], strides = [1, 1]} : vector<16x32xf32> to vector<16x31xf32>
    %519 = vector.extract_strided_slice %23 {offsets = [0, 0], sizes = [16, 1], strides = [1, 1]} : vector<16x32xf32> to vector<16x1xf32>
    %520 = tpu.concatenate %518, %519 in 1 : vector<16x31xf32>, vector<16x1xf32> -> vector<16x32xf32>
    %c79 = arith.constant 79 : index
    %521 = memref.load %arg2[%c79] : memref<81xf32, #tpu.memory_space<smem>>
    %522 = vector.broadcast %521 : f32 to vector<16x32xf32>
    %523 = arith.mulf %522, %520 : vector<16x32xf32>
    %524 = arith.addf %517, %523 : vector<16x32xf32>
    %525 = vector.extract_strided_slice %23 {offsets = [0, 2], sizes = [16, 30], strides = [1, 1]} : vector<16x32xf32> to vector<16x30xf32>
    %526 = vector.extract_strided_slice %23 {offsets = [0, 0], sizes = [16, 2], strides = [1, 1]} : vector<16x32xf32> to vector<16x2xf32>
    %527 = tpu.concatenate %525, %526 in 1 : vector<16x30xf32>, vector<16x2xf32> -> vector<16x32xf32>
    %c80 = arith.constant 80 : index
    %528 = memref.load %arg2[%c80] : memref<81xf32, #tpu.memory_space<smem>>
    %529 = vector.broadcast %528 : f32 to vector<16x32xf32>
    %530 = arith.mulf %529, %527 : vector<16x32xf32>
    %531 = arith.addf %524, %530 : vector<16x32xf32>
    %532 = vector.extract_strided_slice %531 {offsets = [0, 0], sizes = [14, 14], strides = [1, 1]} : vector<16x32xf32> to vector<14x14xf32>
    %c0_31 = arith.constant 0 : index
    %c2_32 = arith.constant 2 : index
    %c0_33 = arith.constant 0 : index
    %c0_34 = arith.constant 0 : index
    %533 = vector.load %arg4[%c0_31, %c2_32, %c0_33, %c0_34] : memref<2x3x14x14xf32, #tpu.memory_space<vmem>>, vector<1x1x14x14xf32>
    %534 = vector.shape_cast %533 : vector<1x1x14x14xf32> to vector<14x14xf32>
    %535 = vector.shape_cast %532 : vector<14x14xf32> to vector<1x1x14x14xf32>
    tpu.vector_store %arg4[%c0_31, %c2_32, %c0_33, %c0_34], %535 {strides = array<i32>} : memref<2x3x14x14xf32, #tpu.memory_space<vmem>>, vector<1x1x14x14xf32>,
    %536 = vector.extract_strided_slice %531 {offsets = [0, 16], sizes = [14, 14], strides = [1, 1]} : vector<16x32xf32> to vector<14x14xf32>
    %c1_35 = arith.constant 1 : index
    %c2_36 = arith.constant 2 : index
    %c0_37 = arith.constant 0 : index
    %c0_38 = arith.constant 0 : index
    %537 = vector.load %arg4[%c1_35, %c2_36, %c0_37, %c0_38] : memref<2x3x14x14xf32, #tpu.memory_space<vmem>>, vector<1x1x14x14xf32>
    %538 = vector.shape_cast %537 : vector<1x1x14x14xf32> to vector<14x14xf32>
    %539 = vector.shape_cast %536 : vector<14x14xf32> to vector<1x1x14x14xf32>
    tpu.vector_store %arg4[%c1_35, %c2_36, %c0_37, %c0_38], %539 {strides = array<i32>} : memref<2x3x14x14xf32, #tpu.memory_space<vmem>>, vector<1x1x14x14xf32>,
    return
  }
  func.func @transform_0(%arg0: i32) -> (i32, i32, i32, i32) {
    %c0_i32 = arith.constant 0 : i32
    %c0_i32_0 = arith.constant 0 : i32
    %c0_i32_1 = arith.constant 0 : i32
    %c0_i32_2 = arith.constant 0 : i32
    return %arg0, %c0_i32, %c0_i32_0, %c0_i32_1 : i32, i32, i32, i32
  }
  func.func @transform_1(%arg0: i32) -> i32 {
    %c0_i32 = arith.constant 0 : i32
    %c0_i32_0 = arith.constant 0 : i32
    return %c0_i32 : i32
  }
  func.func @transform_2(%arg0: i32) -> i32 {
    %c0_i32 = arith.constant 0 : i32
    %c0_i32_0 = arith.constant 0 : i32
    return %c0_i32 : i32
  }
  func.func @transform_3(%arg0: i32) -> (i32, i32, i32, i32) {
    %c0_i32 = arith.constant 0 : i32
    %c0_i32_0 = arith.constant 0 : i32
    %c0_i32_1 = arith.constant 0 : i32
    %c0_i32_2 = arith.constant 0 : i32
    return %arg0, %c0_i32, %c0_i32_0, %c0_i32_1 : i32, i32, i32, i32
  }
}

</mosaic_0001>

<bundles_post_ra>
// kernel: tpu_custom_call.1
= control target key start
LH: loop header
LB: loop body
LE: loop exit
PB: predicated region body
PF: predicated region fallthrough
CT: control target
= control target key end

     0   :  { %6 = vsyncpa [#allocation3], 0  ;;  %s107_s0 = inlined_call_operand.hbm [shape: f32[8,128], index: 0, kind: input, shape index: {}]   ;;  %s108_s1 = inlined_call_operand.hbm [shape: f32[8,128], index: 1, kind: output, shape index: {}]  }
   0x1   :  { %7 = vsyncpa [#allocation4], 0  ;;  %s88_s6 = smov [#allocation2]  }
   0x2   :  { %s14_s7 = sshll.u32 %s88_s6, 4  ;;  %s15_s7 = int_to_ptr.vmem [resolvable:$true] %s14_s7 }
   0x3   :  { %s52_s8 = scalar_lea.vmem %s15_s7, 128  ;;  %p57_p1 = scmp.lt.s32.totalorder %s15_s7, %s15_s7 }
   0x4   :  { %p53_p0 = scmp.ne.s32.totalorder %s15_s7, %s52_s8  ;;  %p58_p2 = scmp.lt.s32.totalorder %s52_s8, %s52_s8 }
   0x6   :  { %p59_p3 = por %p58_p2, %p57_p1 }
   0x8   :  { %p60_p4 = pnand %p59_p3, %p53_p0 }
   0xa   :  { %63 = shalt.err (!%p60_p4)
}
   0xb   :  { %17 = dma.hbm_to_vmem [thread:$0]  %s107_s0, 128, %s15_s7, [#allocation3]  }
   0xc   :  { %84 = dma.done.wait [#allocation3], 128  }
   0xd   :  { %85 = vsyncadd [#allocation3], 4294967168  ;;  %v21_v0 = vld [vmem:[#allocation2] sm:$0xff]  ;;  %s89_s11 = smov 1   ;;  %s90_s12 = smov [#allocation5]  }
   0xe   :  { %22 = vrot.lane.b32.xlu0 %v21_v0, %s89_s11  ;;  %s32_s13 = sshll.u32 %s90_s12, 4  ;;  %s33_s13 = int_to_ptr.vmem [resolvable:$true] %s32_s13 }
   0xf   :  { %s64_s14 = scalar_lea.vmem %s33_s13, 128  ;;  %p69_p6 = scmp.lt.s32.totalorder %s33_s13, %s33_s13 }
  0x10   :  { %p65_p5 = scmp.ne.s32.totalorder %s33_s13, %s64_s14  ;;  %p70_p7 = scmp.lt.s32.totalorder %s64_s14, %s64_s14 }
  0x12   :  { %p71_p8 = por %p70_p7, %p69_p6 }
  0x14   :  { %p72_p9 = pnand %p71_p8, %p65_p5 }
  0x80   :  { %v23_v1 = vpop.permute.xlu0 %22 }
  0x81   :  { %v24_v2 = vrot.slane %v23_v1, 7 }
  0x83   :  { %25 = vst [vmem:[#allocation5] sm:$0xff] %v24_v2 }
  0x84   :  { %75 = shalt.err (!%p72_p9)
}
  0x85   :  { %35 = dma.vmem_to_hbm [thread:$0]  %s33_s13, 128, %s108_s1, [#allocation4]  }
  0x86   :  { %86 = dma.done.wait [#allocation4], 128  }
  0x87   :  { %87 = vsyncadd [#allocation4], 4294967168 }
  0x88   :  { %39 = vsyncpa [#allocation3], 1 }
  0x89   :  { %40 = vsyncpa [#allocation4], 1 }

// kernel: tpu_custom_call.1
= control target key start
LH: loop header
LB: loop body
LE: loop exit
PB: predicated region body
PF: predicated region fallthrough
CT: control target
= control target key end

     0   :  { %8 = vsyncpa [#allocation3], 0  ;;  %s1740_s0 = inlined_call_operand.hbm [shape: f32[1,3,16,32], index: 0, kind: input, shape index: {}]   ;;  %s1741_s1 = inlined_call_operand.vmem [shape: f32[81], index: 1, kind: input, shape index: {}]   ;;  %s1742_s2 = inlined_call_operand.vmem [shape: f32[3], index: 2, kind: input, shape index: {}]   ;;  %s1743_s3 = inlined_call_operand.vmem [shape: f32[2,3,14,14], index: 3, kind: output, shape index: {}]  }
   0x1   :  { %9 = vsyncpa [#allocation4], 0 }
   0x2   :  { %10 = vsyncpa [#allocation7], 0  ;;  %s1065_s12 = smov [#allocation2]   ;;  %s29_s16 = sshll.u32 %s1741_s1, 4  ;;  %s30_s16 = int_to_ptr.vmem [resolvable:$true] %s29_s16 }
   0x3   :  { %s16_s13 = sshll.u32 %s1065_s12, 4  ;;  %s17_s13 = int_to_ptr.vmem [resolvable:$true] %s16_s13 }
   0x4   :  { %s1023_s17 = scalar_lea.vmem %s17_s13, 768  ;;  %p1028_p1 = scmp.lt.s32.totalorder %s17_s13, %s17_s13 }
   0x5   :  { %p1024_p0 = scmp.ne.s32.totalorder %s17_s13, %s1023_s17  ;;  %p1029_p2 = scmp.lt.s32.totalorder %s1023_s17, %s1023_s17 }
   0x7   :  { %p1030_p3 = por %p1029_p2, %p1028_p1 }
   0x9   :  { %p1031_p4 = pnand %p1030_p3, %p1024_p0 }
   0xb   :  { %1034 = shalt.err (!%p1031_p4)
}
   0xc   :  { %s1066_s18 = smov 128   ;;  %s1067_s19 = smov 8  }
   0xd   :  { %22 = dma.hbm_to_vmem [thread:$0]  %s1740_s0, 768, %s17_s13, [#allocation3], %s1066_s18, %s1066_s18, %s1067_s19  }
   0xe   :  { %s1035_s22 = scalar_lea.vmem %s30_s16, 16  ;;  %p1040_p6 = scmp.lt.s32.totalorder %s30_s16, %s30_s16 }
   0xf   :  { %p1036_p5 = scmp.ne.s32.totalorder %s30_s16, %s1035_s22  ;;  %p1041_p7 = scmp.lt.s32.totalorder %s1035_s22, %s1035_s22 }
  0x11   :  { %p1042_p8 = por %p1041_p7, %p1040_p6 }
  0x13   :  { %p1043_p9 = pnand %p1042_p8, %p1036_p5 }
  0x15   :  { %1046 = shalt.err (!%p1043_p9)
}
  0x16   :  { %s1068_s1 = smov [#allocation5]   ;;  %s39_s25 = sshll.u32 %s1742_s2, 4  ;;  %s40_s25 = int_to_ptr.vmem [resolvable:$true] %s39_s25 }
  0x17   :  { %32 = dma.vmem_to_smem %s30_s16, 16, %s1068_s1, [#allocation4]  }
  0x18   :  { %s1047_s26 = scalar_lea.vmem %s40_s25, 16  ;;  %p1052_p11 = scmp.lt.s32.totalorder %s40_s25, %s40_s25 }
  0x19   :  { %p1048_p10 = scmp.ne.s32.totalorder %s40_s25, %s1047_s26  ;;  %p1053_p12 = scmp.lt.s32.totalorder %s1047_s26, %s1047_s26 }
  0x1b   :  { %p1054_p13 = por %p1053_p12, %p1052_p11 }
  0x1d   :  { %p1055_p0 = pnand %p1054_p13, %p1048_p10 }
  0x1f   :  { %1058 = shalt.err (!%p1055_p0)
}
  0x20   :  { %s1069_s0 = smov [#allocation6]  }
  0x21   :  { %42 = dma.vmem_to_smem %s40_s25, 16, %s1069_s0, [#allocation7]  }
  0x22   :  { %1059 = dma.done.wait [#allocation3], 768  }
  0x23   :  { %1060 = vsyncadd [#allocation3], 4294966528 }
  0x24   :  { %1061 = dma.done.wait [#allocation4], 16  }
  0x25   :  { %1062 = vsyncadd [#allocation4], 4294967280 }
  0x26   :  { %1063 = dma.done.wait [#allocation7], 16  }
  0x27   :  { %1064 = vsyncadd [#allocation7], 4294967280 }
  0x28   :  { %52 = sfence }
  0x29   :  { %v1104_v0 = vld [vmem:[#allocation2] sm:$0xff]  ;;  %s1070_s2 = smov 31   ;;  %s1071_s27 = smov 127   ;;  %v1110_v1 = vld [vmem:[#allocation2 + $0x8] sm:$0xff]  ;;  %vm57_vm0 = vcmask 1046528   ;;  %vm65_vm1 = vcmask 1045504  }
  0x2a   :  { %125 = vrot.lane.b32.xlu1 %v1104_v0, %s1070_s2  ;;  %119 = vrot.lane.b32.xlu0 %v1104_v0, %s1071_s27  ;;  %s1072_s28 = smov 126   ;;  %v58_v2 = vrot.slane %v1104_v0, 1  ;;  %v59_v3 = vrot.slane %v1110_v1, 1  ;;  %s1073_s29 = smov 30   ;;  %v66_v6 = vrot.slane %v1104_v0, 2  ;;  %v67_v7 = vrot.slane %v1110_v1, 2 }
  0x2b   :  { %v1172_v10 = vld [vmem:[#allocation2 + $0x18] sm:$0xff]  ;;  %v1174_v11 = vld [vmem:[#allocation2 + $0x10] sm:$0xff]  ;;  %v1240_v20 = vld [vmem:[#allocation2 + $0x28] sm:$0xff]  ;;  %s1248_s30 = sld [smem:[#allocation5]]  ;;  %vm131_vm2 = vcmask 252928   ;;  %vm152_vm3 = vcmask 244736  }
  0x2c   :  { %v1127_v4 = vsel %vm57_vm0, %v59_v3, %v58_v2  ;;  %v1130_v5 = vsel %vm57_vm0, %v58_v2, %v59_v3  ;;  %v1151_v8 = vsel %vm65_vm1, %v67_v7, %v66_v6  ;;  %v1154_v9 = vsel %vm65_vm1, %v66_v6, %v67_v7  ;;  %v1242_v21 = vld [vmem:[#allocation2 + $0x20] sm:$0xff]  ;;  %s1250_s4 = sld [smem:[#allocation5 + $0x1b]] }
  0x2d   :  { %v78_v12 = vrot.slane %v1174_v11, 1  ;;  %v79_v13 = vrot.slane %v1172_v10, 1  ;;  %v85_v16 = vrot.slane %v1174_v11, 2  ;;  %v86_v17 = vrot.slane %v1172_v10, 2  ;;  %s1252_s5 = sld [smem:[#allocation5 + $0x36]] }
  0x2e   :  { %127 = vrot.lane.b32.xlu1 %v1110_v1, %s1070_s2  ;;  %121 = vrot.lane.b32.xlu0 %v1110_v1, %s1071_s27  ;;  %s1258_s6 = sld [smem:[#allocation6]]  ;;  %v97_v22 = vrot.slane %v1242_v21, 1  ;;  %v98_v23 = vrot.slane %v1240_v20, 1  ;;  %v104_v62 = vrot.slane %v1242_v21, 2  ;;  %v105_v63 = vrot.slane %v1240_v20, 2 }
  0x2f   :  { %v1195_v14 = vsel %vm57_vm0, %v79_v13, %v78_v12  ;;  %v1198_v15 = vsel %vm57_vm0, %v78_v12, %v79_v13  ;;  %v1219_v18 = vsel %vm65_vm1, %v86_v17, %v85_v16  ;;  %v1222_v19 = vsel %vm65_vm1, %v85_v16, %v86_v17  ;;  %s1260_s7 = sld [smem:[#allocation5 + $0x1]] }
  0x30   :  { %s1262_s8 = sld [smem:[#allocation6 + $0x1]]  ;;  %v1284_v27 = vsel %vm57_vm0, %v98_v23, %v97_v22  ;;  %v1287_v28 = vsel %vm57_vm0, %v97_v22, %v98_v23  ;;  %v1344_v23 = vsel %vm65_vm1, %v105_v63, %v104_v62  ;;  %vm537_vm4 = vcmask 111616  }
  0x31   :  { %s1264_s9 = sld [smem:[#allocation6 + $0x2]]  ;;  %v114_v24 = vstv %s1248_s30  ;;  %vm535_vm5 = vcmask 113664  }
  0x32   :  { %142 = vrot.lane.b32.xlu1 %v1110_v1, %s1072_s28  ;;  %140 = vrot.lane.b32.xlu0 %v1104_v0, %s1072_s28  ;;  %s1270_s10 = sld [smem:[#allocation5 + $0x1c]]  ;;  %v553_v25 = vstv %s1250_s4  ;;  %v115_v29 = vmul.f32 %v114_v24, %v1104_v0  ;;  %v116_v38 = vmul.f32 %v114_v24, %v1110_v1 }
  0x33   :  { %s1274_s11 = sld [smem:[#allocation5 + $0x37]]  ;;  %v731_v26 = vstv %s1252_s5  ;;  %v554_v30 = vmul.f32 %v553_v25, %v1104_v0  ;;  %v555_v39 = vmul.f32 %v553_v25, %v1110_v1 }
  0x34   :  { %v732_v31 = vmul.f32 %v731_v26, %v1104_v0  ;;  %v112_v32 = vstv %s1258_s6  ;;  %s1300_s12 = sld [smem:[#allocation5 + $0x2]]  ;;  %v733_v45 = vmul.f32 %v731_v26, %v1110_v1  ;;  %v1349_v26 = vsel %vm65_vm1, %v104_v62, %v105_v63 }
  0x35   :  { %v135_v35 = vstv %s1260_s7  ;;  %s1306_s13 = sld [smem:[#allocation5 + $0x1d]]  ;;  %v117_v42 = vadd.f32 %v115_v29, %v112_v32  ;;  %v118_v50 = vadd.f32 %v116_v38, %v112_v32 }
  0x36   :  { %148 = vrot.lane.b32.xlu1 %v1110_v1, %s1073_s29  ;;  %146 = vrot.lane.b32.xlu0 %v1104_v0, %s1073_s29  ;;  %v551_v33 = vstv %s1262_s8  ;;  %s1309_s14 = sld [smem:[#allocation5 + $0x3]] }
  0x37   :  { %v729_v34 = vstv %s1264_s9  ;;  %v556_v43 = vadd.f32 %v554_v30, %v551_v33  ;;  %s1312_s15 = sld [smem:[#allocation5 + $0x1e]]  ;;  %v557_v51 = vadd.f32 %v555_v39, %v551_v33 }
  0x38   :  { %v559_v36 = vstv %s1270_s10  ;;  %v734_v44 = vadd.f32 %v732_v31, %v729_v34  ;;  %s1318_s16 = sld [smem:[#allocation5 + $0x39]]  ;;  %v735_v56 = vadd.f32 %v733_v45, %v729_v34 }
  0x39   :  { %v737_v37 = vstv %s1274_s11  ;;  %s1320_s17 = sld [smem:[#allocation5 + $0x38]] }
  0x3a   :  { %170 = vrot.lane.b32.xlu1 %v1127_v4, %s1071_s27  ;;  %168 = vrot.lane.b32.xlu0 %v1130_v5, %s1071_s27  ;;  %s1330_s18 = sld [smem:[#allocation5 + $0x4]]  ;;  %v156_v16 = vstv %s1300_s12 }
  0x3b   :  { %s1337_s19 = sld [smem:[#allocation5 + $0x1f]]  ;;  %v565_v17 = vstv %s1306_s13 }
  0x3c   :  { %v162_v7 = vstv %s1309_s14  ;;  %s1346_s20 = sld [smem:[#allocation5 + $0x3a]] }
  0x3d   :  { %v571_v12 = vstv %s1312_s15  ;;  %v164_v29 = vmul.f32 %v162_v7, %v1127_v4  ;;  %v163_v30 = vmul.f32 %v162_v7, %v1130_v5  ;;  %s1359_s21 = sld [smem:[#allocation5 + $0x5]] }
  0x3e   :  { %176 = vrot.lane.b32.xlu1 %v1127_v4, %s1070_s2  ;;  %174 = vrot.lane.b32.xlu0 %v1130_v5, %s1070_s2  ;;  %v749_v13 = vstv %s1318_s16  ;;  %v573_v33 = vmul.f32 %v571_v12, %v1127_v4  ;;  %s1365_s22 = sld [smem:[#allocation5 + $0x20]] }
  0x3f   :  { %v743_v22 = vstv %s1320_s17  ;;  %v751_v34 = vmul.f32 %v749_v13, %v1127_v4  ;;  %s1367_s1 = sld [smem:[#allocation5 + $0x6]] }
  0x40   :  { %s1370_s23 = sld [smem:[#allocation5 + $0x21]] }
  0x41   :  { %s1374_s24 = sld [smem:[#allocation5 + $0x3c]] }
  0x42   :  { %190 = vrot.lane.b32.xlu1 %v1127_v4, %s1072_s28  ;;  %188 = vrot.lane.b32.xlu0 %v1130_v5, %s1072_s28  ;;  %s1380_s25 = sld [smem:[#allocation5 + $0x3b]] }
  0x43   :  { %s1389_s26 = sld [smem:[#allocation5 + $0x7]] }
  0x44   :  { %s1394_s0 = sld [smem:[#allocation5 + $0x22]] }
  0x45   :  { %s1419_s30 = sld [smem:[#allocation5 + $0x24]] }
  0x46   :  { %196 = vrot.lane.b32.xlu1 %v1127_v4, %s1073_s29  ;;  %194 = vrot.lane.b32.xlu0 %v1130_v5, %s1073_s29  ;;  %s1421_s4 = sld [smem:[#allocation5 + $0x3f]] }
  0x47   :  { %s1425_s5 = sld [smem:[#allocation5 + $0x3e]] }
  0x48   :  { %s1430_s6 = sld [smem:[#allocation5 + $0xa]] }
  0x49   :  { %s1437_s7 = sld [smem:[#allocation5 + $0x25]] }
  0x4a   :  { %217 = vrot.lane.b32.xlu1 %v1151_v8, %s1071_s27  ;;  %215 = vrot.lane.b32.xlu0 %v1154_v9, %s1071_s27  ;;  %s1440_s8 = sld [smem:[#allocation5 + $0x40]] }
  0x4b   :  { %s1447_s9 = sld [smem:[#allocation5 + $0xb]] }
  0x4c   :  { %s1449_s10 = sld [smem:[#allocation5 + $0x26]] }
  0x4d   :  { %s1453_s11 = sld [smem:[#allocation5 + $0xc]] }
  0x4e   :  { %223 = vrot.lane.b32.xlu1 %v1151_v8, %s1070_s2  ;;  %221 = vrot.lane.b32.xlu0 %v1154_v9, %s1070_s2  ;;  %s1455_s12 = sld [smem:[#allocation5 + $0x27]] }
  0x4f   :  { %s1457_s13 = sld [smem:[#allocation5 + $0x42]] }
  0x50   :  { %s1459_s14 = sld [smem:[#allocation5 + $0x41]] }
  0x51   :  { %s1473_s15 = sld [smem:[#allocation5 + $0xd]] }
  0x52   :  { %237 = vrot.lane.b32.xlu1 %v1151_v8, %s1072_s28  ;;  %235 = vrot.lane.b32.xlu0 %v1154_v9, %s1072_s28  ;;  %s1477_s16 = sld [smem:[#allocation5 + $0x28]] }
  0x53   :  { %s1481_s17 = sld [smem:[#allocation5 + $0x43]] }
  0x56   :  { %243 = vrot.lane.b32.xlu1 %v1151_v8, %s1073_s29  ;;  %241 = vrot.lane.b32.xlu0 %v1154_v9, %s1073_s29 }
  0x5a   :  { %263 = vrot.lane.b32.xlu1 %v1172_v10, %s1071_s27  ;;  %261 = vrot.lane.b32.xlu0 %v1174_v11, %s1071_s27 }
  0x5e   :  { %269 = vrot.lane.b32.xlu1 %v1172_v10, %s1070_s2  ;;  %267 = vrot.lane.b32.xlu0 %v1174_v11, %s1070_s2 }
  0x62   :  { %283 = vrot.lane.b32.xlu1 %v1172_v10, %s1072_s28  ;;  %281 = vrot.lane.b32.xlu0 %v1174_v11, %s1072_s28 }
  0x66   :  { %289 = vrot.lane.b32.xlu1 %v1172_v10, %s1073_s29  ;;  %287 = vrot.lane.b32.xlu0 %v1174_v11, %s1073_s29 }
  0x6a   :  { %310 = vrot.lane.b32.xlu1 %v1195_v14, %s1071_s27  ;;  %308 = vrot.lane.b32.xlu0 %v1198_v15, %s1071_s27 }
  0x6e   :  { %316 = vrot.lane.b32.xlu1 %v1195_v14, %s1070_s2  ;;  %314 = vrot.lane.b32.xlu0 %v1198_v15, %s1070_s2 }
  0x72   :  { %330 = vrot.lane.b32.xlu1 %v1195_v14, %s1072_s28  ;;  %328 = vrot.lane.b32.xlu0 %v1198_v15, %s1072_s28 }
  0x76   :  { %336 = vrot.lane.b32.xlu1 %v1195_v14, %s1073_s29  ;;  %334 = vrot.lane.b32.xlu0 %v1198_v15, %s1073_s29 }
  0x7a   :  { %357 = vrot.lane.b32.xlu1 %v1219_v18, %s1071_s27  ;;  %355 = vrot.lane.b32.xlu0 %v1222_v19, %s1071_s27 }
  0x7e   :  { %363 = vrot.lane.b32.xlu1 %v1219_v18, %s1070_s2  ;;  %361 = vrot.lane.b32.xlu0 %v1222_v19, %s1070_s2 }
  0x82   :  { %377 = vrot.lane.b32.xlu1 %v1219_v18, %s1072_s28  ;;  %375 = vrot.lane.b32.xlu0 %v1222_v19, %s1072_s28 }
  0x86   :  { %383 = vrot.lane.b32.xlu1 %v1219_v18, %s1073_s29  ;;  %381 = vrot.lane.b32.xlu0 %v1222_v19, %s1073_s29 }
  0x8a   :  { %403 = vrot.lane.b32.xlu1 %v1240_v20, %s1071_s27  ;;  %401 = vrot.lane.b32.xlu0 %v1242_v21, %s1071_s27 }
  0x8e   :  { %409 = vrot.lane.b32.xlu1 %v1240_v20, %s1070_s2  ;;  %407 = vrot.lane.b32.xlu0 %v1242_v21, %s1070_s2 }
  0x92   :  { %423 = vrot.lane.b32.xlu1 %v1240_v20, %s1072_s28  ;;  %421 = vrot.lane.b32.xlu0 %v1242_v21, %s1072_s28 }
  0x96   :  { %429 = vrot.lane.b32.xlu1 %v1240_v20, %s1073_s29  ;;  %427 = vrot.lane.b32.xlu0 %v1242_v21, %s1073_s29 }
  0x9a   :  { %450 = vrot.lane.b32.xlu1 %v1284_v27, %s1071_s27  ;;  %448 = vrot.lane.b32.xlu0 %v1287_v28, %s1071_s27 }
  0x9c   :  { %v126_v40 = vpop.permute.xlu1 %125  ;;  %v120_v41 = vpop.permute.xlu0 %119 }
  0x9d   :  { %v132_v46 = vsel %vm131_vm2, %v120_v41, %v126_v40  ;;  %v572_v41 = vmul.f32 %v571_v12, %v1130_v5 }
  0x9e   :  { %v136_v47 = vmul.f32 %v135_v35, %v132_v46  ;;  %v560_v48 = vmul.f32 %v559_v36, %v132_v46  ;;  %v738_v49 = vmul.f32 %v737_v37, %v132_v46  ;;  %456 = vrot.lane.b32.xlu1 %v1284_v27, %s1070_s2  ;;  %454 = vrot.lane.b32.xlu0 %v1287_v28, %s1070_s2 }
  0xa0   :  { %v138_v52 = vadd.f32 %v136_v47, %v117_v42  ;;  %v562_v53 = vadd.f32 %v560_v48, %v556_v43  ;;  %v740_v54 = vadd.f32 %v738_v49, %v734_v44  ;;  %v128_v55 = vpop.permute.xlu1 %127  ;;  %v122_v57 = vpop.permute.xlu0 %121  ;;  %v750_v42 = vmul.f32 %v749_v13, %v1130_v5 }
  0xa1   :  { %v133_v58 = vsel %vm131_vm2, %v122_v57, %v128_v55  ;;  %v755_v57 = vstv %s1346_s20  ;;  %s1490_s20 = sld [smem:[#allocation5 + $0xf]] }
  0xa2   :  { %v137_v59 = vmul.f32 %v135_v35, %v133_v58  ;;  %v561_v60 = vmul.f32 %v559_v36, %v133_v58  ;;  %v739_v61 = vmul.f32 %v737_v37, %v133_v58  ;;  %470 = vrot.lane.b32.xlu1 %v1284_v27, %s1072_s28  ;;  %468 = vrot.lane.b32.xlu0 %v1287_v28, %s1072_s28 }
  0xa4   :  { %v139_v0 = vadd.f32 %v137_v59, %v118_v50  ;;  %v563_v1 = vadd.f32 %v561_v60, %v557_v51  ;;  %v741_v2 = vadd.f32 %v739_v61, %v735_v56  ;;  %v143_v3 = vpop.permute.xlu1 %142  ;;  %v141_v6 = vpop.permute.xlu0 %140  ;;  %v183_v50 = vstv %s1330_s18  ;;  %s1486_s18 = sld [smem:[#allocation5 + $0xe]] }
  0xa6   :  { %476 = vrot.lane.b32.xlu1 %v1284_v27, %s1073_s29  ;;  %474 = vrot.lane.b32.xlu0 %v1287_v28, %s1073_s29 }
  0xa8   :  { %v149_v24 = vpop.permute.xlu1 %148  ;;  %v147_v25 = vpop.permute.xlu0 %146 }
  0xa9   :  { %v154_v31 = vsel %vm152_vm3, %v143_v3, %v149_v24  ;;  %v153_v32 = vsel %vm152_vm3, %v141_v6, %v147_v25  ;;  %v209_v25 = vstv %s1367_s1  ;;  %s1496_s1 = sld [smem:[#allocation5 + $0x44]] }
  0xaa   :  { %v158_v35 = vmul.f32 %v156_v16, %v154_v31  ;;  %v567_v36 = vmul.f32 %v565_v17, %v154_v31  ;;  %v745_v37 = vmul.f32 %v743_v22, %v154_v31  ;;  %v157_v38 = vmul.f32 %v156_v16, %v153_v32  ;;  %497 = vrot.lane.b32.xlu1 %v1344_v23, %s1071_s27 }
  0xab   :  { %v566_v39 = vmul.f32 %v565_v17, %v153_v32  ;;  %v744_v40 = vmul.f32 %v743_v22, %v153_v32  ;;  %495 = vrot.lane.b32.xlu0 %v1349_v26, %s1071_s27  ;;  %v203_v31 = vstv %s1359_s21  ;;  %v583_v32 = vstv %s1365_s22  ;;  %s1410_s27 = sld [smem:[#allocation5 + $0x8]] }
  0xac   :  { %v160_v4 = vadd.f32 %v158_v35, %v139_v0  ;;  %v569_v43 = vadd.f32 %v567_v36, %v563_v1  ;;  %v747_v44 = vadd.f32 %v745_v37, %v741_v2  ;;  %v159_v45 = vadd.f32 %v157_v38, %v138_v52  ;;  %v171_v46 = vpop.permute.xlu1 %170  ;;  %v169_v47 = vpop.permute.xlu0 %168  ;;  %s1492_s21 = sld [smem:[#allocation5 + $0x2a]] }
  0xad   :  { %v568_v48 = vadd.f32 %v566_v39, %v562_v53  ;;  %v746_v49 = vadd.f32 %v744_v40, %v740_v54  ;;  %v577_v52 = vstv %s1337_s19  ;;  %v211_v36 = vmul.f32 %v209_v25, %v1151_v8  ;;  %s1488_s19 = sld [smem:[#allocation5 + $0x29]] }
  0xae   :  { %503 = vrot.lane.b32.xlu1 %v1344_v23, %s1070_s2  ;;  %v166_v5 = vadd.f32 %v164_v29, %v160_v4  ;;  %v575_v51 = vadd.f32 %v573_v33, %v569_v43  ;;  %v753_v55 = vadd.f32 %v751_v34, %v747_v44  ;;  %v165_v56 = vadd.f32 %v163_v30, %v159_v45  ;;  %s1494_s22 = sld [smem:[#allocation5 + $0x45]] }
  0xaf   :  { %501 = vrot.lane.b32.xlu0 %v1349_v26, %s1070_s2  ;;  %v574_v58 = vadd.f32 %v572_v41, %v568_v48  ;;  %v752_v53 = vadd.f32 %v750_v42, %v746_v49  ;;  %v589_v29 = vstv %s1370_s23  ;;  %v767_v30 = vstv %s1374_s24  ;;  %s1402_s2 = sld [smem:[#allocation5 + $0x3d]] }
  0xb0   :  { %v177_v54 = vpop.permute.xlu1 %176  ;;  %v175_v59 = vpop.permute.xlu0 %174  ;;  %v761_v33 = vstv %s1380_s25  ;;  %v210_v37 = vmul.f32 %v209_v25, %v1154_v9  ;;  %v591_v40 = vmul.f32 %v589_v29, %v1151_v8  ;;  %v769_v41 = vmul.f32 %v767_v30, %v1151_v8  ;;  %s1511_s23 = sld [smem:[#allocation5 + $0x10]] }
  0xb1   :  { %v181_v60 = vsel %vm131_vm2, %v171_v46, %v177_v54  ;;  %v180_v61 = vsel %vm131_vm2, %v169_v47, %v175_v59  ;;  %v590_v47 = vmul.f32 %v589_v29, %v1154_v9  ;;  %v768_v48 = vmul.f32 %v767_v30, %v1154_v9  ;;  %s1515_s24 = sld [smem:[#allocation5 + $0x2b]] }
  0xb2   :  { %v185_v62 = vmul.f32 %v183_v50, %v181_v60  ;;  %v579_v63 = vmul.f32 %v577_v52, %v181_v60  ;;  %v757_v0 = vmul.f32 %v755_v57, %v181_v60  ;;  %v184_v1 = vmul.f32 %v183_v50, %v180_v61  ;;  %517 = vrot.lane.b32.xlu1 %v1344_v23, %s1072_s28  ;;  %s1521_s25 = sld [smem:[#allocation5 + $0x46]] }
  0xb3   :  { %v578_v2 = vmul.f32 %v577_v52, %v180_v61  ;;  %v756_v3 = vmul.f32 %v755_v57, %v180_v61  ;;  %515 = vrot.lane.b32.xlu0 %v1349_v26, %s1072_s28  ;;  %s1414_s28 = sld [smem:[#allocation5 + $0x23]]  ;;  %v230_v57 = vstv %s1389_s26  ;;  %v595_v59 = vstv %s1394_s0 }
  0xb4   :  { %v187_v6 = vadd.f32 %v185_v62, %v166_v5  ;;  %v581_v7 = vadd.f32 %v579_v63, %v575_v51  ;;  %v759_v12 = vadd.f32 %v757_v0, %v753_v55  ;;  %v186_v13 = vadd.f32 %v184_v1, %v165_v56  ;;  %v191_v16 = vpop.permute.xlu1 %190  ;;  %v189_v17 = vpop.permute.xlu0 %188  ;;  %s1523_s26 = sld [smem:[#allocation5 + $0x11]] }
  0xb5   :  { %v580_v22 = vadd.f32 %v578_v2, %v574_v58  ;;  %v758_v24 = vadd.f32 %v756_v3, %v752_v53  ;;  %v773_v60 = vstv %s1402_s2  ;;  %s1525_s0 = sld [smem:[#allocation5 + $0x2c]] }
  0xb6   :  { %523 = vrot.lane.b32.xlu1 %v1344_v23, %s1073_s29  ;;  %s1527_s2 = sld [smem:[#allocation5 + $0x47]] }
  0xb7   :  { %521 = vrot.lane.b32.xlu0 %v1349_v26, %s1073_s29  ;;  %s1416_s29 = sld [smem:[#allocation5 + $0x9]] }
  0xb8   :  { %v197_v34 = vpop.permute.xlu1 %196  ;;  %v195_v35 = vpop.permute.xlu0 %194 }
  0xb9   :  { %v201_v38 = vsel %vm152_vm3, %v191_v16, %v197_v34  ;;  %v200_v39 = vsel %vm152_vm3, %v189_v17, %v195_v35  ;;  %v607_v34 = vstv %s1419_s30  ;;  %v785_v35 = vstv %s1421_s4  ;;  %s1547_s30 = sld [smem:[#allocation5 + $0x13]] }
  0xba   :  { %v205_v42 = vmul.f32 %v203_v31, %v201_v38  ;;  %v585_v4 = vmul.f32 %v583_v32, %v201_v38  ;;  %v763_v43 = vmul.f32 %v761_v33, %v201_v38  ;;  %v204_v44 = vmul.f32 %v203_v31, %v200_v39  ;;  %s1549_s4 = sld [smem:[#allocation5 + $0x2e]] }
  0xbb   :  { %v584_v45 = vmul.f32 %v583_v32, %v200_v39  ;;  %v762_v46 = vmul.f32 %v761_v33, %v200_v39  ;;  %v779_v38 = vstv %s1425_s5  ;;  %s1551_s5 = sld [smem:[#allocation5 + $0x49]] }
  0xbc   :  { %v207_v49 = vadd.f32 %v205_v42, %v187_v6  ;;  %v587_v50 = vadd.f32 %v585_v4, %v581_v7  ;;  %v765_v8 = vadd.f32 %v763_v43, %v759_v12  ;;  %v206_v5 = vadd.f32 %v204_v44, %v186_v13  ;;  %v218_v51 = vpop.permute.xlu1 %217  ;;  %v216_v55 = vpop.permute.xlu0 %215 }
  0xbd   :  { %v586_v56 = vadd.f32 %v584_v45, %v580_v22  ;;  %v764_v52 = vadd.f32 %v762_v46, %v758_v24  ;;  %v256_v33 = vstv %s1416_s29  ;;  %v609_v44 = vmul.f32 %v607_v34, %v1172_v10  ;;  %s1545_s29 = sld [smem:[#allocation5 + $0x48]] }
  0xbe   :  { %v213_v58 = vadd.f32 %v211_v36, %v207_v49  ;;  %v593_v53 = vadd.f32 %v591_v40, %v587_v50  ;;  %v771_v9 = vadd.f32 %v769_v41, %v765_v8  ;;  %v212_v54 = vadd.f32 %v210_v37, %v206_v5 }
  0xbf   :  { %v592_v61 = vadd.f32 %v590_v47, %v586_v56  ;;  %v770_v62 = vadd.f32 %v768_v48, %v764_v52  ;;  %v250_v36 = vstv %s1410_s27  ;;  %v601_v37 = vstv %s1414_s28  ;;  %s1529_s27 = sld [smem:[#allocation5 + $0x12]] }
  0xc0   :  { %v224_v63 = vpop.permute.xlu1 %223  ;;  %v222_v0 = vpop.permute.xlu0 %221  ;;  %v258_v41 = vmul.f32 %v256_v33, %v1172_v10  ;;  %v257_v42 = vmul.f32 %v256_v33, %v1174_v11  ;;  %v787_v45 = vmul.f32 %v785_v35, %v1172_v10  ;;  %v608_v5 = vmul.f32 %v607_v34, %v1174_v11  ;;  %s1539_s28 = sld [smem:[#allocation5 + $0x2d]] }
  0xc1   :  { %v228_v1 = vsel %vm131_vm2, %v218_v51, %v224_v63  ;;  %v227_v2 = vsel %vm131_vm2, %v216_v55, %v222_v0  ;;  %v786_v51 = vmul.f32 %v785_v35, %v1174_v11  ;;  %v797_v33 = vstv %s1459_s14  ;;  %s1622_s14 = sld [smem:[#allocation5 + $0x4c]] }
  0xc2   :  { %v232_v3 = vmul.f32 %v230_v57, %v228_v1  ;;  %v597_v6 = vmul.f32 %v595_v59, %v228_v1  ;;  %v775_v7 = vmul.f32 %v773_v60, %v228_v1  ;;  %v231_v12 = vmul.f32 %v230_v57, %v227_v2 }
  0xc3   :  { %v596_v13 = vmul.f32 %v595_v59, %v227_v2  ;;  %v774_v16 = vmul.f32 %v773_v60, %v227_v2  ;;  %v276_v1 = vstv %s1430_s6  ;;  %v613_v2 = vstv %s1437_s7  ;;  %s1553_s6 = sld [smem:[#allocation5 + $0x14]] }
  0xc4   :  { %v234_v17 = vadd.f32 %v232_v3, %v213_v58  ;;  %v599_v22 = vadd.f32 %v597_v6, %v593_v53  ;;  %v777_v24 = vadd.f32 %v775_v7, %v771_v9  ;;  %v233_v25 = vadd.f32 %v231_v12, %v212_v54  ;;  %v238_v29 = vpop.permute.xlu1 %237  ;;  %v236_v30 = vpop.permute.xlu0 %235  ;;  %s1555_s7 = sld [smem:[#allocation5 + $0x15]] }
  0xc5   :  { %v598_v31 = vadd.f32 %v596_v13, %v592_v61  ;;  %v776_v32 = vadd.f32 %v774_v16, %v770_v62  ;;  %v791_v6 = vstv %s1440_s8  ;;  %v302_v12 = vstv %s1453_s11  ;;  %s1558_s8 = sld [smem:[#allocation5 + $0x2f]] }
  0xc6   :  { %v304_v34 = vmul.f32 %v302_v12, %v1195_v14  ;;  %v303_v35 = vmul.f32 %v302_v12, %v1198_v15  ;;  %s1591_s11 = sld [smem:[#allocation5 + $0x4b]] }
  0xc8   :  { %v244_v39 = vpop.permute.xlu1 %243  ;;  %v242_v40 = vpop.permute.xlu0 %241 }
  0xc9   :  { %v248_v4 = vsel %vm152_vm3, %v238_v29, %v244_v39  ;;  %v247_v43 = vsel %vm152_vm3, %v236_v30, %v242_v40  ;;  %v296_v30 = vstv %s1447_s9  ;;  %s1561_s9 = sld [smem:[#allocation5 + $0x4a]] }
  0xca   :  { %v252_v46 = vmul.f32 %v250_v36, %v248_v4  ;;  %v603_v47 = vmul.f32 %v601_v37, %v248_v4  ;;  %v781_v48 = vmul.f32 %v779_v38, %v248_v4  ;;  %v251_v49 = vmul.f32 %v250_v36, %v247_v43 }
  0xcb   :  { %v602_v50 = vmul.f32 %v601_v37, %v247_v43  ;;  %v780_v8 = vmul.f32 %v779_v38, %v247_v43 }
  0xcc   :  { %v254_v55 = vadd.f32 %v252_v46, %v234_v17  ;;  %v605_v56 = vadd.f32 %v603_v47, %v599_v22  ;;  %v783_v52 = vadd.f32 %v781_v48, %v777_v24  ;;  %v253_v10 = vadd.f32 %v251_v49, %v233_v25  ;;  %v264_v57 = vpop.permute.xlu1 %263  ;;  %v262_v58 = vpop.permute.xlu0 %261 }
  0xcd   :  { %v604_v53 = vadd.f32 %v602_v50, %v598_v31  ;;  %v782_v9 = vadd.f32 %v780_v8, %v776_v32  ;;  %v625_v24 = vstv %s1455_s12  ;;  %v803_v31 = vstv %s1457_s13  ;;  %s1613_s12 = sld [smem:[#allocation5 + $0x16]] }
  0xce   :  { %v260_v54 = vadd.f32 %v258_v41, %v254_v55  ;;  %v611_v11 = vadd.f32 %v609_v44, %v605_v56  ;;  %v789_v59 = vadd.f32 %v787_v45, %v783_v52  ;;  %v259_v60 = vadd.f32 %v257_v42, %v253_v10  ;;  %s1618_s13 = sld [smem:[#allocation5 + $0x31]] }
  0xcf   :  { %v610_v61 = vadd.f32 %v608_v5, %v604_v53  ;;  %v788_v62 = vadd.f32 %v786_v51, %v782_v9  ;;  %v619_v32 = vstv %s1449_s10  ;;  %v627_v38 = vmul.f32 %v625_v24, %v1195_v14  ;;  %s1567_s10 = sld [smem:[#allocation5 + $0x30]] }
  0xd0   :  { %v270_v63 = vpop.permute.xlu1 %269  ;;  %v268_v0 = vpop.permute.xlu0 %267  ;;  %v626_v39 = vmul.f32 %v625_v24, %v1198_v15  ;;  %v805_v43 = vmul.f32 %v803_v31, %v1195_v14  ;;  %v804_v44 = vmul.f32 %v803_v31, %v1198_v15  ;;  %v343_v31 = vstv %s1486_s18  ;;  %s1644_s18 = sld [smem:[#allocation5 + $0x33]] }
  0xd1   :  { %v274_v3 = vsel %vm131_vm2, %v264_v57, %v270_v63  ;;  %v273_v7 = vsel %vm131_vm2, %v262_v58, %v268_v0 }
  0xd2   :  { %v278_v13 = vmul.f32 %v276_v1, %v274_v3  ;;  %v615_v16 = vmul.f32 %v613_v2, %v274_v3  ;;  %v793_v25 = vmul.f32 %v791_v6, %v274_v3  ;;  %v277_v29 = vmul.f32 %v276_v1, %v273_v7 }
  0xd3   :  { %v614_v36 = vmul.f32 %v613_v2, %v273_v7  ;;  %v792_v37 = vmul.f32 %v791_v6, %v273_v7  ;;  %v323_v2 = vstv %s1473_s15  ;;  %v631_v3 = vstv %s1477_s16  ;;  %s1626_s15 = sld [smem:[#allocation5 + $0x17]] }
  0xd4   :  { %v284_v17 = vpop.permute.xlu1 %283  ;;  %v282_v22 = vpop.permute.xlu0 %281  ;;  %v280_v40 = vadd.f32 %v278_v13, %v260_v54  ;;  %v617_v41 = vadd.f32 %v615_v16, %v611_v11  ;;  %v795_v45 = vadd.f32 %v793_v25, %v789_v59  ;;  %v279_v46 = vadd.f32 %v277_v29, %v259_v60  ;;  %s1636_s16 = sld [smem:[#allocation5 + $0x32]] }
  0xd5   :  { %v616_v51 = vadd.f32 %v614_v36, %v610_v61  ;;  %v794_v14 = vadd.f32 %v792_v37, %v788_v62  ;;  %v809_v7 = vstv %s1481_s17  ;;  %v349_v13 = vstv %s1490_s20  ;;  %s1642_s17 = sld [smem:[#allocation5 + $0x18]] }
  0xd6   :  { %v643_v25 = vstv %s1492_s21  ;;  %v350_v36 = vmul.f32 %v349_v13, %v1222_v19  ;;  %s1649_s20 = sld [smem:[#allocation5 + $0x4d]] }
  0xd7   :  { %s1666_s21 = sld [smem:[#allocation5 + $0x19]] }
  0xd8   :  { %v290_v42 = vpop.permute.xlu1 %289  ;;  %v288_v4 = vpop.permute.xlu0 %287 }
  0xd9   :  { %v294_v47 = vsel %vm152_vm3, %v284_v17, %v290_v42  ;;  %v293_v48 = vsel %vm152_vm3, %v282_v22, %v288_v4 }
  0xda   :  { %v298_v49 = vmul.f32 %v296_v30, %v294_v47  ;;  %v621_v50 = vmul.f32 %v619_v32, %v294_v47  ;;  %v799_v8 = vmul.f32 %v797_v33, %v294_v47  ;;  %v297_v5 = vmul.f32 %v296_v30, %v293_v48 }
  0xdb   :  { %v620_v55 = vmul.f32 %v619_v32, %v293_v48  ;;  %v798_v56 = vmul.f32 %v797_v33, %v293_v48  ;;  %v821_v32 = vstv %s1494_s22  ;;  %v637_v33 = vstv %s1488_s19  ;;  %s1646_s19 = sld [smem:[#allocation5 + $0x4e]] }
  0xdc   :  { %v300_v15 = vadd.f32 %v298_v49, %v280_v40  ;;  %v623_v52 = vadd.f32 %v621_v50, %v617_v41  ;;  %v801_v10 = vadd.f32 %v799_v8, %v795_v45  ;;  %v299_v57 = vadd.f32 %v297_v5, %v279_v46  ;;  %v311_v58 = vpop.permute.xlu1 %310  ;;  %v309_v53 = vpop.permute.xlu0 %308  ;;  %s1672_s22 = sld [smem:[#allocation5 + $0x34]] }
  0xdd   :  { %v622_v9 = vadd.f32 %v620_v55, %v616_v51  ;;  %v800_v54 = vadd.f32 %v798_v56, %v794_v14  ;;  %v644_v40 = vmul.f32 %v643_v25, %v1222_v19  ;;  %v822_v45 = vmul.f32 %v821_v32, %v1222_v19 }
  0xde   :  { %v306_v11 = vadd.f32 %v304_v34, %v300_v15  ;;  %v629_v59 = vadd.f32 %v627_v38, %v623_v52  ;;  %v807_v60 = vadd.f32 %v805_v43, %v801_v10  ;;  %v305_v61 = vadd.f32 %v303_v35, %v299_v57 }
  0xdf   :  { %v628_v62 = vadd.f32 %v626_v39, %v622_v9  ;;  %v806_v63 = vadd.f32 %v804_v44, %v800_v54  ;;  %v815_v34 = vstv %s1496_s1  ;;  %v351_v35 = vmul.f32 %v349_v13, %v1219_v18  ;;  %s1674_s1 = sld [smem:[#allocation5 + $0x4f]] }
  0xe0   :  { %v317_v0 = vpop.permute.xlu1 %316  ;;  %v315_v1 = vpop.permute.xlu0 %314  ;;  %v645_v39 = vmul.f32 %v643_v25, %v1219_v18  ;;  %v823_v44 = vmul.f32 %v821_v32, %v1219_v18  ;;  %v827_v13 = vstv %s1521_s25  ;;  %s1680_s25 = sld [smem:[#allocation5 + $0x50]] }
  0xe1   :  { %v321_v6 = vsel %vm131_vm2, %v311_v58, %v317_v0  ;;  %v320_v12 = vsel %vm131_vm2, %v309_v53, %v315_v1 }
  0xe2   :  { %v325_v16 = vmul.f32 %v323_v2, %v321_v6  ;;  %v633_v17 = vmul.f32 %v631_v3, %v321_v6  ;;  %v811_v29 = vmul.f32 %v809_v7, %v321_v6  ;;  %v324_v30 = vmul.f32 %v323_v2, %v320_v12 }
  0xe3   :  { %v632_v37 = vmul.f32 %v631_v3, %v320_v12  ;;  %v810_v38 = vmul.f32 %v809_v7, %v320_v12  ;;  %v396_v3 = vstv %s1529_s27  ;;  %v661_v6 = vstv %s1539_s28 }
  0xe4   :  { %v331_v22 = vpop.permute.xlu1 %330  ;;  %v329_v24 = vpop.permute.xlu0 %328  ;;  %v327_v41 = vadd.f32 %v325_v16, %v306_v11  ;;  %v635_v42 = vadd.f32 %v633_v17, %v629_v59  ;;  %v813_v46 = vadd.f32 %v811_v29, %v807_v60  ;;  %v326_v47 = vadd.f32 %v324_v30, %v305_v61 }
  0xe5   :  { %v634_v14 = vadd.f32 %v632_v37, %v628_v62  ;;  %v812_v55 = vadd.f32 %v810_v38, %v806_v63  ;;  %v370_v7 = vstv %s1511_s23  ;;  %v649_v12 = vstv %s1515_s24  ;;  %s1676_s23 = sld [smem:[#allocation5 + $0x1a]] }
  0xe6   :  { %v839_v16 = vstv %s1545_s29  ;;  %v390_v17 = vstv %s1523_s26  ;;  %v398_v30 = vmul.f32 %v396_v3, %v1240_v20  ;;  %v663_v32 = vmul.f32 %v661_v6, %v1240_v20  ;;  %s1678_s24 = sld [smem:[#allocation5 + $0x35]]  ;;  %s1074_s26 = smov 112  }
  0xe7   :  { %v841_v37 = vmul.f32 %v839_v16, %v1240_v20  ;;  %v1585_v38 = vmul.f32 %v839_v16, %v1242_v21  ;;  %v442_v20 = vstv %s1555_s7 }
  0xe8   :  { %v337_v4 = vpop.permute.xlu1 %336  ;;  %v335_v43 = vpop.permute.xlu0 %334 }
  0xe9   :  { %v341_v48 = vsel %vm152_vm3, %v331_v22, %v337_v4  ;;  %v340_v49 = vsel %vm152_vm3, %v329_v24, %v335_v43  ;;  %v655_v22 = vstv %s1525_s0  ;;  %v833_v24 = vstv %s1527_s2 }
  0xea   :  { %v345_v50 = vmul.f32 %v343_v31, %v341_v48  ;;  %v639_v8 = vmul.f32 %v637_v33, %v341_v48  ;;  %v817_v5 = vmul.f32 %v815_v34, %v341_v48  ;;  %v344_v51 = vmul.f32 %v343_v31, %v340_v49 }
  0xeb   :  { %v638_v56 = vmul.f32 %v637_v33, %v340_v49  ;;  %v816_v18 = vmul.f32 %v815_v34, %v340_v49  ;;  %v1576_v33 = vmul.f32 %v396_v3, %v1242_v21  ;;  %v1579_v34 = vmul.f32 %v661_v6, %v1242_v21 }
  0xec   :  { %v347_v19 = vadd.f32 %v345_v50, %v327_v41  ;;  %v641_v15 = vadd.f32 %v639_v8, %v635_v42  ;;  %v819_v52 = vadd.f32 %v817_v5, %v813_v46  ;;  %v346_v10 = vadd.f32 %v344_v51, %v326_v47  ;;  %v358_v57 = vpop.permute.xlu1 %357  ;;  %v356_v58 = vpop.permute.xlu0 %355 }
  0xed   :  { %v640_v53 = vadd.f32 %v638_v56, %v634_v14  ;;  %v818_v9 = vadd.f32 %v816_v18, %v812_v55  ;;  %v845_v41 = vstv %s1551_s5  ;;  %v436_v42 = vstv %s1553_s6 }
  0xee   :  { %v1531_v54 = vadd.f32 %v351_v35, %v347_v19  ;;  %v1533_v11 = vadd.f32 %v645_v39, %v641_v15  ;;  %v1535_v59 = vadd.f32 %v823_v44, %v819_v52  ;;  %v1537_v60 = vadd.f32 %v350_v36, %v346_v10 }
  0xef   :  { %v1541_v61 = vadd.f32 %v644_v40, %v640_v53  ;;  %v1543_v62 = vadd.f32 %v822_v45, %v818_v9  ;;  %v416_v36 = vstv %s1547_s30  ;;  %v667_v40 = vstv %s1549_s4 }
  0xf0   :  { %v364_v63 = vpop.permute.xlu1 %363  ;;  %v362_v0 = vpop.permute.xlu0 %361  ;;  %v673_v49 = vstv %s1558_s8  ;;  %v851_v51 = vstv %s1561_s9  ;;  %v1598_v56 = vmul.f32 %v442_v20, %v1284_v27  ;;  %v679_v18 = vstv %s1567_s10 }
  0xf1   :  { %v368_v31 = vsel %vm131_vm2, %v358_v57, %v364_v63  ;;  %v367_v35 = vsel %vm131_vm2, %v356_v58, %v362_v0 }
  0xf2   :  { %v372_v4 = vmul.f32 %v370_v7, %v368_v31  ;;  %v651_v43 = vmul.f32 %v649_v12, %v368_v31  ;;  %v829_v47 = vmul.f32 %v827_v13, %v368_v31  ;;  %v371_v48 = vmul.f32 %v370_v7, %v367_v35 }
  0xf3   :  { %v650_v21 = vmul.f32 %v649_v12, %v367_v35  ;;  %v828_v50 = vmul.f32 %v827_v13, %v367_v35  ;;  %v857_v7 = vstv %s1591_s11  ;;  %v443_v12 = vmul.f32 %v442_v20, %v1287_v28 }
  0xf4   :  { %v378_v1 = vpop.permute.xlu1 %377  ;;  %v376_v2 = vpop.permute.xlu0 %375  ;;  %v374_v19 = vadd.f32 %v372_v4, %v1531_v54  ;;  %v653_v15 = vadd.f32 %v651_v43, %v1533_v11  ;;  %v831_v53 = vadd.f32 %v829_v47, %v1535_v59  ;;  %v373_v9 = vadd.f32 %v371_v48, %v1537_v60 }
  0xf5   :  { %v652_v63 = vadd.f32 %v650_v21, %v1541_v61  ;;  %v859_v35 = vmul.f32 %v857_v7, %v1284_v27 }
  0xf8   :  { %v384_v25 = vpop.permute.xlu1 %383  ;;  %v382_v29 = vpop.permute.xlu0 %381 }
  0xf9   :  { %v388_v39 = vsel %vm152_vm3, %v378_v1, %v384_v25  ;;  %v387_v44 = vsel %vm152_vm3, %v376_v2, %v382_v29  ;;  %v830_v1 = vadd.f32 %v828_v50, %v1543_v62  ;;  %v681_v25 = vmul.f32 %v679_v18, %v1284_v27 }
  0xfa   :  { %v392_v8 = vmul.f32 %v390_v17, %v388_v39  ;;  %v657_v5 = vmul.f32 %v655_v22, %v388_v39  ;;  %v835_v14 = vmul.f32 %v833_v24, %v388_v39  ;;  %v391_v55 = vmul.f32 %v390_v17, %v387_v44 }
  0xfb   :  { %v656_v52 = vmul.f32 %v655_v22, %v387_v44  ;;  %v834_v10 = vmul.f32 %v833_v24, %v387_v44  ;;  %v680_v62 = vmul.f32 %v679_v18, %v1287_v28  ;;  %v858_v39 = vmul.f32 %v857_v7, %v1287_v28 }
  0xfc   :  { %v404_v45 = vpop.permute.xlu1 %403  ;;  %v402_v46 = vpop.permute.xlu0 %401  ;;  %v394_v2 = vadd.f32 %v392_v8, %v374_v19  ;;  %v659_v3 = vadd.f32 %v657_v5, %v653_v15  ;;  %v837_v6 = vadd.f32 %v835_v14, %v831_v53  ;;  %v393_v11 = vadd.f32 %v391_v55, %v373_v9 }
  0xfd   :  { %v658_v13 = vadd.f32 %v656_v52, %v652_v63  ;;  %v836_v16 = vadd.f32 %v834_v10, %v830_v1  ;;  %v685_v1 = vstv %s1618_s13 }
  0xfe   :  { %v400_v29 = vadd.f32 %v398_v30, %v394_v2  ;;  %v665_v31 = vadd.f32 %v663_v32, %v659_v3  ;;  %v843_v4 = vadd.f32 %v841_v37, %v837_v6  ;;  %v399_v43 = vadd.f32 %v1576_v33, %v393_v11 }
  0xff   :  { %v664_v32 = vadd.f32 %v1579_v34, %v658_v13  ;;  %v863_v3 = vstv %s1622_s14  ;;  %v697_v13 = vstv %s1644_s18 }
 0x100   :  { %v410_v57 = vpop.permute.xlu1 %409  ;;  %v408_v58 = vpop.permute.xlu0 %407 }
 0x101   :  { %v414_v0 = vsel %vm131_vm2, %v404_v45, %v410_v57  ;;  %v413_v54 = vsel %vm131_vm2, %v402_v46, %v408_v58  ;;  %v842_v46 = vadd.f32 %v1585_v38, %v836_v16 }
 0x102   :  { %v418_v59 = vmul.f32 %v416_v36, %v414_v0  ;;  %v669_v17 = vmul.f32 %v667_v40, %v414_v0  ;;  %v847_v61 = vmul.f32 %v845_v41, %v414_v0  ;;  %v417_v24 = vmul.f32 %v416_v36, %v413_v54 }
 0x103   :  { %v668_v44 = vmul.f32 %v667_v40, %v413_v54  ;;  %v846_v45 = vmul.f32 %v845_v41, %v413_v54  ;;  %v463_v0 = vstv %s1613_s12  ;;  %v489_v54 = vstv %s1642_s17 }
 0x104   :  { %v424_v60 = vpop.permute.xlu1 %423  ;;  %v422_v22 = vpop.permute.xlu0 %421  ;;  %v420_v36 = vadd.f32 %v418_v59, %v400_v29  ;;  %v671_v30 = vadd.f32 %v669_v17, %v665_v31  ;;  %v849_v33 = vadd.f32 %v847_v61, %v843_v4  ;;  %v419_v37 = vadd.f32 %v417_v24, %v399_v43 }
 0x105   :  { %v670_v48 = vadd.f32 %v668_v44, %v664_v32  ;;  %v848_v21 = vadd.f32 %v846_v45, %v842_v46  ;;  %v483_v17 = vstv %s1626_s15  ;;  %v869_v61 = vstv %s1649_s20 }
 0x106   :  { %v491_v24 = vmul.f32 %v489_v54, %v1344_v23  ;;  %v699_v31 = vmul.f32 %v697_v13, %v1344_v23 }
 0x108   :  { %v430_v27 = vpop.permute.xlu1 %429  ;;  %v428_v28 = vpop.permute.xlu0 %427 }
 0x109   :  { %v434_v40 = vsel %vm152_vm3, %v424_v60, %v430_v27  ;;  %v433_v41 = vsel %vm152_vm3, %v422_v22, %v428_v28  ;;  %v875_v60 = vstv %s1646_s19  ;;  %v691_v22 = vstv %s1636_s16 }
 0x10a   :  { %v438_v20 = vmul.f32 %v436_v42, %v434_v40  ;;  %v675_v34 = vmul.f32 %v673_v49, %v434_v40  ;;  %v853_v38 = vmul.f32 %v851_v51, %v434_v40  ;;  %v437_v47 = vmul.f32 %v436_v42, %v433_v41 }
 0x10b   :  { %v674_v50 = vmul.f32 %v673_v49, %v433_v41  ;;  %v852_v8 = vmul.f32 %v851_v51, %v433_v41  ;;  %v877_v45 = vmul.f32 %v875_v60, %v1344_v23 }
 0x10c   :  { %v440_v5 = vadd.f32 %v438_v20, %v420_v36  ;;  %v677_v14 = vadd.f32 %v675_v34, %v671_v30  ;;  %v855_v55 = vadd.f32 %v853_v38, %v849_v33  ;;  %v439_v18 = vadd.f32 %v437_v47, %v419_v37  ;;  %v451_v19 = vpop.permute.xlu1 %450  ;;  %v449_v15 = vpop.permute.xlu0 %448 }
 0x10d   :  { %v676_v42 = vadd.f32 %v674_v50, %v670_v48  ;;  %v854_v52 = vadd.f32 %v852_v8, %v848_v21  ;;  %v876_v36 = vmul.f32 %v875_v60, %v1349_v26 }
 0x10e   :  { %v446_v49 = vadd.f32 %v1598_v56, %v440_v5  ;;  %v683_v51 = vadd.f32 %v681_v25, %v677_v14  ;;  %v861_v10 = vadd.f32 %v859_v35, %v855_v55  ;;  %v445_v57 = vadd.f32 %v443_v12, %v439_v18 }
 0x10f   :  { %v682_v58 = vadd.f32 %v680_v62, %v676_v42  ;;  %v860_v53 = vadd.f32 %v858_v39, %v854_v52  ;;  %v490_v25 = vmul.f32 %v489_v54, %v1349_v26  ;;  %v698_v35 = vmul.f32 %v697_v13, %v1349_v26 }
 0x110   :  { %v457_v9 = vpop.permute.xlu1 %456  ;;  %v455_v63 = vpop.permute.xlu0 %454 }
 0x111   :  { %v461_v2 = vsel %vm131_vm2, %v451_v19, %v457_v9  ;;  %v460_v56 = vsel %vm131_vm2, %v449_v15, %v455_v63 }
 0x112   :  { %v465_v6 = vmul.f32 %v463_v0, %v461_v2  ;;  %v687_v11 = vmul.f32 %v685_v1, %v461_v2  ;;  %v865_v16 = vmul.f32 %v863_v3, %v461_v2  ;;  %v464_v59 = vmul.f32 %v463_v0, %v460_v56 }
 0x113   :  { %v686_v62 = vmul.f32 %v685_v1, %v460_v56  ;;  %v864_v29 = vmul.f32 %v863_v3, %v460_v56 }
 0x114   :  { %v471_v7 = vpop.permute.xlu1 %470  ;;  %v469_v12 = vpop.permute.xlu0 %468  ;;  %v467_v39 = vadd.f32 %v465_v6, %v446_v49  ;;  %v689_v4 = vadd.f32 %v687_v11, %v683_v51  ;;  %v867_v30 = vadd.f32 %v865_v16, %v861_v10  ;;  %v466_v32 = vadd.f32 %v464_v59, %v445_v57 }
 0x115   :  { %v688_v41 = vadd.f32 %v686_v62, %v682_v58  ;;  %v866_v20 = vadd.f32 %v864_v29, %v860_v53  ;;  %v510_v49 = vstv %s1666_s21  ;;  %v703_v51 = vstv %s1672_s22 }
 0x116   :  { %v881_v58 = vstv %s1674_s1  ;;  %v530_v6 = vstv %s1676_s23  ;;  %v709_v11 = vstv %s1678_s24 }
 0x118   :  { %v477_v43 = vpop.permute.xlu1 %476  ;;  %v475_v44 = vpop.permute.xlu0 %474 }
 0x119   :  { %v481_v46 = vsel %vm152_vm3, %v471_v7, %v477_v43  ;;  %v480_v27 = vsel %vm152_vm3, %v469_v12, %v475_v44  ;;  %v887_v7 = vstv %s1680_s25 }
 0x11a   :  { %v485_v28 = vmul.f32 %v483_v17, %v481_v46  ;;  %v693_v33 = vmul.f32 %v691_v22, %v481_v46  ;;  %v871_v37 = vmul.f32 %v869_v61, %v481_v46  ;;  %v484_v40 = vmul.f32 %v483_v17, %v480_v27 }
 0x11b   :  { %v692_v34 = vmul.f32 %v691_v22, %v480_v27  ;;  %v870_v23 = vmul.f32 %v869_v61, %v480_v27 }
 0x11c   :  { %v487_v38 = vadd.f32 %v485_v28, %v467_v39  ;;  %v695_v26 = vadd.f32 %v693_v33, %v689_v4  ;;  %v873_v47 = vadd.f32 %v871_v37, %v867_v30  ;;  %v486_v48 = vadd.f32 %v484_v40, %v466_v32  ;;  %v498_v21 = vpop.permute.xlu1 %497 }
 0x11d   :  { %v694_v50 = vadd.f32 %v692_v34, %v688_v41  ;;  %v872_v8 = vadd.f32 %v870_v23, %v866_v20  ;;  %v496_v5 = vpop.permute.xlu0 %495 }
 0x11e   :  { %v493_v14 = vadd.f32 %v491_v24, %v487_v38  ;;  %v492_v55 = vadd.f32 %v490_v25, %v486_v48  ;;  %v701_v18 = vadd.f32 %v699_v31, %v695_v26  ;;  %v879_v19 = vadd.f32 %v877_v45, %v873_v47 }
 0x11f   :  { %v700_v15 = vadd.f32 %v698_v35, %v694_v50  ;;  %v878_v42 = vadd.f32 %v876_v36, %v872_v8 }
 0x120   :  { %v504_v52 = vpop.permute.xlu1 %503 }
 0x121   :  { %v508_v10 = vsel %vm131_vm2, %v498_v21, %v504_v52  ;;  %v502_v57 = vpop.permute.xlu0 %501 }
 0x122   :  { %v507_v53 = vsel %vm131_vm2, %v496_v5, %v502_v57  ;;  %v512_v9 = vmul.f32 %v510_v49, %v508_v10  ;;  %v705_v63 = vmul.f32 %v703_v51, %v508_v10  ;;  %v883_v1 = vmul.f32 %v881_v58, %v508_v10 }
 0x123   :  { %v511_v2 = vmul.f32 %v510_v49, %v507_v53  ;;  %v704_v3 = vmul.f32 %v703_v51, %v507_v53  ;;  %v882_v54 = vmul.f32 %v881_v58, %v507_v53 }
 0x124   :  { %v518_v0 = vpop.permute.xlu1 %517  ;;  %v514_v13 = vadd.f32 %v512_v9, %v493_v14  ;;  %v707_v16 = vadd.f32 %v705_v63, %v701_v18  ;;  %v885_v61 = vadd.f32 %v883_v1, %v879_v19 }
 0x125   :  { %v516_v56 = vpop.permute.xlu0 %515  ;;  %v513_v60 = vadd.f32 %v511_v2, %v492_v55  ;;  %v706_v22 = vadd.f32 %v704_v3, %v700_v15  ;;  %v884_v4 = vadd.f32 %v882_v54, %v878_v42 }
 0x128   :  { %v524_v12 = vpop.permute.xlu1 %523 }
 0x129   :  { %v528_v59 = vsel %vm152_vm3, %v518_v0, %v524_v12  ;;  %v522_v17 = vpop.permute.xlu0 %521 }
 0x12a   :  { %v532_v24 = vmul.f32 %v530_v6, %v528_v59  ;;  %v711_v25 = vmul.f32 %v709_v11, %v528_v59  ;;  %v889_v62 = vmul.f32 %v887_v7, %v528_v59  ;;  %v527_v29 = vsel %vm152_vm3, %v516_v56, %v522_v17 }
 0x12b   :  { %v531_v31 = vmul.f32 %v530_v6, %v527_v29  ;;  %v710_v35 = vmul.f32 %v709_v11, %v527_v29  ;;  %v888_v39 = vmul.f32 %v887_v7, %v527_v29 }
 0x12c   :  { %v534_v43 = vadd.f32 %v532_v24, %v514_v13  ;;  %v713_v44 = vadd.f32 %v711_v25, %v707_v16  ;;  %v891_v45 = vadd.f32 %v889_v62, %v885_v61 }
 0x12d   :  { %v533_v36 = vadd.f32 %v531_v31, %v513_v60  ;;  %v712_v30 = vadd.f32 %v710_v35, %v706_v22  ;;  %v890_v32 = vadd.f32 %v888_v39, %v884_v4 }
 0x12e   :  { %543 = vrot.lane.b32.xlu1 %v534_v43, %s1074_s26  ;;  %538 = vst.msk [vmem:[%s1743_s3 + $0x8] sm:$0x3f] %vm537_vm4, %v534_v43  ;;  %970 = vst.msk [vmem:[%s1743_s3 + $0x18] sm:$0x3f] %vm537_vm4, %v713_v44 }
 0x12f   :  { %1002 = vst.msk [vmem:[%s1743_s3 + $0x28] sm:$0x3f] %vm537_vm4, %v891_v45  ;;  %541 = vrot.lane.b32.xlu0 %v533_v36, %s1074_s26 }
 0x130   :  { %536 = vst.msk [vmem:[%s1743_s3] sm:$0xff] %vm535_vm5, %v533_v36  ;;  %969 = vst.msk [vmem:[%s1743_s3 + $0x10] sm:$0xff] %vm535_vm5, %v712_v30 }
 0x131   :  { %1001 = vst.msk [vmem:[%s1743_s3 + $0x20] sm:$0xff] %vm535_vm5, %v890_v32 }
 0x132   :  { %721 = vrot.lane.b32.xlu1 %v713_v44, %s1074_s26 }
 0x133   :  { %719 = vrot.lane.b32.xlu0 %v712_v30, %s1074_s26 }
 0x136   :  { %899 = vrot.lane.b32.xlu1 %v891_v45, %s1074_s26 }
 0x137   :  { %897 = vrot.lane.b32.xlu0 %v890_v32, %s1074_s26 }
 0x1a0   :  { %v544_v46 = vpop.permute.xlu1 %543 }
 0x1a1   :  { %940 = vst.msk [vmem:[%s1743_s3 + $0x38] sm:$0x3f] %vm537_vm4, %v544_v46  ;;  %v542_v27 = vpop.permute.xlu0 %541 }
 0x1a2   :  { %939 = vst.msk [vmem:[%s1743_s3 + $0x30] sm:$0xff] %vm535_vm5, %v542_v27 }
 0x1a4   :  { %v722_v28 = vpop.permute.xlu1 %721 }
 0x1a5   :  { %972 = vst.msk [vmem:[%s1743_s3 + $0x48] sm:$0x3f] %vm537_vm4, %v722_v28  ;;  %v720_v33 = vpop.permute.xlu0 %719 }
 0x1a6   :  { %971 = vst.msk [vmem:[%s1743_s3 + $0x40] sm:$0xff] %vm535_vm5, %v720_v33 }
 0x1a8   :  { %v900_v37 = vpop.permute.xlu1 %899 }
 0x1a9   :  { %1004 = vst.msk [vmem:[%s1743_s3 + $0x58] sm:$0x3f] %vm537_vm4, %v900_v37  ;;  %v898_v40 = vpop.permute.xlu0 %897 }
 0x1aa   :  { %1003 = vst.msk [vmem:[%s1743_s3 + $0x50] sm:$0xff] %vm535_vm5, %v898_v40 }
 0x1ab   :  { %910 = vsyncpa [#allocation3], 1 }
 0x1ac   :  { %911 = vsyncpa [#allocation4], 1 }
 0x1ad   :  { %912 = vsyncpa [#allocation7], 1 }

</bundles_post_ra>
